<compile_context>
chip_gen: v7x
topology: tpu7x:2x2x1
jax: 0.10.0
libtpu: 0.0.40
codegen_flags: <defaults>
</compile_context>

<pallas_src>
import jax
import jax.numpy as jnp
import numpy as np
from jax.experimental import pallas as pl
from jax.experimental.pallas import tpu as pltpu

K1 = 25        # conv1 kernel width  (1, 25)
CMID = 30      # conv1 / conv2 output channels
POOL = 75      # AvgPool2d kernel  (1, 75)
STRIDE = 15    # AvgPool2d stride


def fe_kernel(x_ref, m_ref, b_ref, o_ref):
    # x_ref: (1, BB, H*W)   m_ref: (H*W, 30*P)   b_ref: (1, 30*P)
    # o_ref: (1, BB, 30*P)
    o_ref[0] = jnp.dot(x_ref[0], m_ref[...],
                       preferred_element_type=jnp.float32) + b_ref[...]


def _pick_batch_block(B, cap=256):
    """Largest divisor of B (<= cap) keeping >= 2 grid steps (2 TCs on v7x)."""
    if B <= 1:
        return 1
    best = 1
    for d in range(1, min(B // 2, cap) + 1):
        if B % d == 0:
            best = d
    return best


def fe_forward(x, w1t, b1, w2f, b2):
    """x: (B, H, W) f32.  w1t: (30, 25), b1: (30, 1), w2f: (30, 30*H), b2: (30, 1)."""
    B, H, W = x.shape
    W1 = W - K1 + 1
    P = (W1 - POOL) // STRIDE + 1

    # ---- wrapper-side weight folding (weight-only; could be cached) ----
    # conv2 ∘ conv1:  w_eff[d, k, h] = sum_c w2[d, c, h] * w1[c, k]
    w2_r = w2f.reshape(CMID, CMID, H)
    w_eff = jnp.einsum('dch,ck->dkh', w2_r, w1t)                    # (30, K1, H)
    b_eff = jnp.einsum('dch,c->d', w2_r, b1[:, 0]) + b2[:, 0]       # (30,)

    # avg-pool window + conv1 shift as an indicator tensor:
    # T[k, w, p] = 1/POOL if p*STRIDE <= w - k < p*STRIDE + POOL else 0
    w_idx = jnp.arange(W)[None, :, None]
    k_idx = jnp.arange(K1)[:, None, None]
    p_idx = jnp.arange(P)[None, None, :]
    shifted = w_idx - k_idx
    T = ((shifted >= p_idx * STRIDE) &
         (shifted < p_idx * STRIDE + POOL)).astype(jnp.float32) / POOL   # (K1, W, P)

    # Fully folded map:  M[h*W + w, d*P + p] = sum_k w_eff[d,k,h] * T[k,w,p]
    M = jnp.einsum('dkh,kwp->hwdp', w_eff, T).reshape(H * W, CMID * P)
    b_row = jnp.repeat(b_eff, P).reshape(1, CMID * P)                # col order d*P+p

    BB = _pick_batch_block(B)
    NG = B // BB
    x_r = x.reshape(NG, BB, H * W)   # contiguous reshape (layout plumbing only)

    out = pl.pallas_call(
        fe_kernel,
        out_shape=jax.ShapeDtypeStruct((NG, BB, CMID * P), jnp.float32),
        grid_spec=pltpu.PrefetchScalarGridSpec(
            num_scalar_prefetch=0,
            grid=(NG,),
            in_specs=[
                pl.BlockSpec((1, BB, H * W), lambda i: (i, 0, 0)),       # x block
                pl.BlockSpec((H * W, CMID * P), lambda i: (0, 0)),       # M (resident)
                pl.BlockSpec((1, CMID * P), lambda i: (0, 0)),           # bias row
            ],
            out_specs=pl.BlockSpec((1, BB, CMID * P), lambda i: (i, 0, 0)),
        ),
        compiler_params=pltpu.CompilerParams(
            dimension_semantics=("parallel",)),
    )(x_r, M, b_row)

    # (NG, BB, 30*P) -> (B, 30*P); column order already matches nn.Flatten.
    return out.reshape(B, CMID * P)


def fe_ref(x, w1t, b1, w2f, b2):
    """Pure-JAX reference (same math as the PyTorch module, unfused)."""
    B, H, W = x.shape
    W1 = W - K1 + 1
    P = (W1 - POOL) // STRIDE + 1
    patches = jnp.stack([x[:, :, k:k + W1] for k in range(K1)], axis=-1)   # (B,H,W1,K1)
    out1 = jnp.einsum('bhwk,ck->bchw', patches, w1t) + b1.reshape(1, CMID, 1, 1)
    out2 = jnp.einsum('bchw,dch->bdw', out1,
                      w2f.reshape(CMID, CMID, H)) + b2.reshape(1, CMID, 1)
    pooled = jnp.stack([out2[:, :, p * STRIDE: p * STRIDE + POOL].mean(axis=2)
                        for p in range(P)], axis=2)
    return pooled.reshape(B, CMID * P)


if __name__ == "__main__":
    B, H, W = 2, 32, 114          # batch, channel_size, time samples
    key = jax.random.PRNGKey(0)
    kx, kw1, kb1, kw2, kb2 = jax.random.split(key, 5)

    x = jax.random.normal(kx, (B, H, W), jnp.float32)
    # deterministic synthetic params (shapes follow the nn.Conv2d definitions)
    w1t = jax.random.normal(kw1, (CMID, K1), jnp.float32) * (1.0 / K1) ** 0.5
    b1 = jax.random.normal(kb1, (CMID, 1), jnp.float32) * 0.1
    w2f = jax.random.normal(kw2, (CMID, CMID * H), jnp.float32) * (1.0 / (CMID * H)) ** 0.5
    b2 = jax.random.normal(kb2, (CMID, 1), jnp.float32) * 0.1

    out = jax.block_until_ready(fe_forward(x, w1t, b1, w2f, b2))

    P = (W - K1 + 1 - POOL) // STRIDE + 1
    assert out.shape == (B, CMID * P), out.shape
    ref = fe_ref(x, w1t, b1, w2f, b2)
    np.testing.assert_allclose(np.asarray(out), np.asarray(ref),
                               rtol=1e-4, atol=1e-4)
    print("KERNEL_OK")
</pallas_src>

<mosaic_0001>
module attributes {stable_mosaic.version = 11 : i64} {
  func.func @fe_kernel(%arg0: i32, %arg1: memref<1x1x3648xf32, #tpu.memory_space<vmem>>, %arg2: memref<3648x60xf32, #tpu.memory_space<vmem>>, %arg3: memref<1x60xf32, #tpu.memory_space<vmem>>, %arg4: memref<1x1x60xf32, #tpu.memory_space<vmem>>) attributes {dimension_semantics = [#tpu.dimension_semantics<parallel>], iteration_bounds = array<i64: 2>, scalar_prefetch = 0 : i64, scratch_operands = 0 : i64, tpu.core_type = #tpu.core_type<tc>, window_params = [{transform_indices = @transform_0, window_bounds = array<i64: 1, 1, 3648>}, {pipeline_mode = #tpu.pipeline_mode<synchronous>, transform_indices = @transform_1, window_bounds = array<i64: 3648, 60>}, {pipeline_mode = #tpu.pipeline_mode<synchronous>, transform_indices = @transform_2, window_bounds = array<i64: 1, 60>}, {transform_indices = @transform_3, window_bounds = array<i64: 1, 1, 60>}]} {
    %c0 = arith.constant 0 : index
    %c0_0 = arith.constant 0 : index
    %c0_1 = arith.constant 0 : index
    %0 = vector.load %arg1[%c0, %c0_0, %c0_1] : memref<1x1x3648xf32, #tpu.memory_space<vmem>>, vector<1x1x3648xf32>
    %1 = vector.shape_cast %0 : vector<1x1x3648xf32> to vector<1x3648xf32>
    %c0_2 = arith.constant 0 : index
    %c0_3 = arith.constant 0 : index
    %2 = vector.load %arg2[%c0_2, %c0_3] : memref<3648x60xf32, #tpu.memory_space<vmem>>, vector<3648x60xf32>
    %cst = arith.constant dense<0.000000e+00> : vector<1x60xf32>
    %3 = tpu.matmul %1, %2, %cst {dimension_numbers = #tpu.dot_dimension_numbers<[1], [0], [0], [1], [0, 0, 1, 1], [], []>} : vector<1x3648xf32>, vector<3648x60xf32>, vector<1x60xf32> -> vector<1x60xf32>
    %c0_4 = arith.constant 0 : index
    %c0_5 = arith.constant 0 : index
    %4 = vector.load %arg3[%c0_4, %c0_5] : memref<1x60xf32, #tpu.memory_space<vmem>>, vector<1x60xf32>
    %5 = arith.addf %3, %4 : vector<1x60xf32>
    %c0_6 = arith.constant 0 : index
    %c0_7 = arith.constant 0 : index
    %c0_8 = arith.constant 0 : index
    %6 = vector.load %arg4[%c0_6, %c0_7, %c0_8] : memref<1x1x60xf32, #tpu.memory_space<vmem>>, vector<1x1x60xf32>
    %7 = vector.shape_cast %6 : vector<1x1x60xf32> to vector<1x60xf32>
    %8 = vector.shape_cast %5 : vector<1x60xf32> to vector<1x1x60xf32>
    tpu.vector_store %arg4[%c0_6, %c0_7, %c0_8], %8 {strides = array<i32>} : memref<1x1x60xf32, #tpu.memory_space<vmem>>, vector<1x1x60xf32>,
    return
  }
  func.func @transform_0(%arg0: i32) -> (i32, i32, i32) {
    %c0_i32 = arith.constant 0 : i32
    %c0_i32_0 = arith.constant 0 : i32
    %c0_i32_1 = arith.constant 0 : i32
    return %arg0, %c0_i32, %c0_i32_0 : i32, i32, i32
  }
  func.func @transform_1(%arg0: i32) -> (i32, i32) {
    %c0_i32 = arith.constant 0 : i32
    %c0_i32_0 = arith.constant 0 : i32
    %c0_i32_1 = arith.constant 0 : i32
    return %c0_i32, %c0_i32_0 : i32, i32
  }
  func.func @transform_2(%arg0: i32) -> (i32, i32) {
    %c0_i32 = arith.constant 0 : i32
    %c0_i32_0 = arith.constant 0 : i32
    %c0_i32_1 = arith.constant 0 : i32
    return %c0_i32, %c0_i32_0 : i32, i32
  }
  func.func @transform_3(%arg0: i32) -> (i32, i32, i32) {
    %c0_i32 = arith.constant 0 : i32
    %c0_i32_0 = arith.constant 0 : i32
    %c0_i32_1 = arith.constant 0 : i32
    return %arg0, %c0_i32, %c0_i32_0 : i32, i32, i32
  }
}

</mosaic_0001>

<bundles_post_ra>
// kernel: tpu_custom_call.1
= control target key start
LH: loop header
LB: loop body
LE: loop exit
PB: predicated region body
PF: predicated region fallthrough
CT: control target
= control target key end

     0   :  { %8 = vsyncpa [#allocation3], 0  ;;  %s4588_s0 = inlined_call_operand.vmem [shape: f32[2,1,3648], index: 0, kind: input, shape index: {}]   ;;  %s4589_s1 = inlined_call_operand.vmem [shape: f32[3648,60], index: 1, kind: input, shape index: {}]   ;;  %s4590_s2 = inlined_call_operand.vmem [shape: f32[1,60], index: 2, kind: input, shape index: {}]   ;;  %s4591_s3 = inlined_call_operand.hbm [shape: f32[2,1,60], index: 3, kind: output, shape index: {}]  }
   0x1   :  { %10 = vsyncpa [#allocation3 + $0x1], 0  ;;  %s3014_s12 = smov 0   ;;  %s3016_s13 = smov 0  }
   0x2   :  { %s3018_s14 = smov 0   ;;  %s3020_s15 = smov 0  }
   0x3 LB: > { %s3035_s16 = sadd.s32 4294967295, %s2988_s15   ;;  %s1897_s17 = sadd.s32 4294967294, %s2988_s15   ;;  %s2988_s15 = sphi %s3020_s15, %s4597_s15   ;;  %s2984_s14 = sphi %s3018_s14, %s4596_s14   ;;  %s2980_s13 = sphi %s3016_s13, %s4595_s13   ;;  %s2976_s12 = sphi %s3014_s12, %s4594_s12  }
   0x4   : > { %s3039_s18 = sadd.s32 1, %s2988_s15   ;;  %s91_s19 = sadd.s32 1, %s2984_s14 }
   0x5   : > { %s88_s20 = ssub.s32 %s2988_s15, %s3039_s18  ;;  %p101_p0 = scmp.ne.s32.totalorder %s2984_s14, %s2980_s13 }
   0x6   : > { %p89_p1 = scmp.eq.s32.totalorder %s88_s20, 0  ;;  %p102_p2 = scmp.eq.s32.totalorder %s3035_s16, 1 }
   0x7   : > { %p107_p3 = scmp.ne.s32.totalorder %s2980_s13, %s2976_s12  ;;  %p108_p4 = scmp.eq.s32.totalorder %s1897_s17, 1 }
   0x8   : > { %s3050_s21 = scalar_select %p89_p1, %s2984_s14, %s91_s19  }
   0x9   : > { %p3052_p5 = por %p102_p2, %p101_p0  ;;  %p3056_p6 = por %p108_p4, %p107_p3 }
   0xa   : > { %p1900_p7 = scmp.ge.s32.totalorder %s2988_s15, 1  ;;  %p139_p8 = scmp.lt.s32.totalorder %s2988_s15, 3 }
   0xc   : > { %p140_p9 = pnand %p1900_p7, %p139_p8 }
   0xd   : > { %v185_v0 = vld [vmem:[%s4589_s1 + $0x80] sm:$0xff] (!%p140_p9)  ;;  %v186_v1 = vld [vmem:[%s4589_s1 + $0x88] sm:$0xff] (!%p140_p9)  ;;  %v187_v11 = vld [vmem:[%s4589_s1 + $0x90] sm:$0xff] (!%p140_p9)  ;;  %p161_p10 = scmp.lt.s32.totalorder (!%p140_p9), %s3035_s16, 1  ;;  %v630_v43 = vlaneseq (!%p140_p9)  ;;  %vm2991_vm0 = vmmov (!%p140_p9), 0   ;;  %vm774_vm1 = vcmask (!%p140_p9), 523264  }
   0xe   : > { %143 = sbr.rel (%p140_p9) target bundleno = 484 (0x1e4), region = 32  ;;  %v169_v2 = vld [vmem:[%s4589_s1] sm:$0xff] (!%p140_p9)  ;;  %v2423_v3 = vpack.c.bf16 (!%p140_p9), %v186_v1, %v185_v0  ;;  %v170_v4 = vld [vmem:[%s4589_s1 + $0x8] sm:$0xff] (!%p140_p9)  ;;  %v188_v13 = vld [vmem:[%s4589_s1 + $0x98] sm:$0xff] (!%p140_p9)  ;;  %s159_s29 = sand.u32 (!%p140_p9), 1, %s2980_s13   ;;  %vm1827_vm2 = vcmask (!%p140_p9), 483328  }
   0xf   : > { %v217_v5 = vld [vmem:[%s4589_s1 + $0x180] sm:$0xff] (!%p140_p9)  ;;  %v218_v6 = vld [vmem:[%s4589_s1 + $0x188] sm:$0xff] (!%p140_p9)  ;;  %v2425_v7 = vpack.c.bf16 (!%p140_p9), %v170_v4, %v169_v2  ;;  %v171_v14 = vld [vmem:[%s4589_s1 + $0x10] sm:$0xff] (!%p140_p9)  ;;  %v2427_v16 = vpack.c.bf16 (!%p140_p9), %v188_v13, %v187_v11  ;;  %v3186_v57 = vshrl.u32 (!%p140_p9), %v630_v43, 7  ;;  %s1902_s4 = sshll.u32 (!%p140_p9), %s3035_s16, 4  ;;  %s160_s6 = scalar_lea.vmem (!%p140_p9), [#allocation2], %s159_s29 }
  0x10   : > { %v2455_v8 = vpack.c.bf16 (!%p140_p9), %v218_v6, %v217_v5  ;;  %v201_v9 = vld [vmem:[%s4589_s1 + $0x100] sm:$0xff] (!%p140_p9)  ;;  %v202_v10 = vld [vmem:[%s4589_s1 + $0x108] sm:$0xff] (!%p140_p9)  ;;  %2424 = vmatprep.subr.bf16.mxu0 (!%p140_p9), %v2423_v3  ;;  %v172_v15 = vld [vmem:[%s4589_s1 + $0x18] sm:$0xff] (!%p140_p9)  ;;  %s1842_s8 = sshll.u32 (!%p140_p9), %s160_s6, 4  ;;  %s4546_s11 = scalar_lea.hbm (!%p140_p9), %s4591_s3, %s1902_s4  ;;  %s4548_s8 = int_to_ptr.vmem [resolvable:$true] %s1842_s8 }
  0x11   : > { %v2457_v12 = vpack.c.bf16 (!%p140_p9), %v202_v10, %v201_v9  ;;  %2426 = vmatpush3.bf16.msra.mxu0 (!%p140_p9), %v2425_v7  ;;  %v2429_v17 = vpack.c.bf16 (!%p140_p9), %v172_v15, %v171_v14  ;;  %v219_v18 = vld [vmem:[%s4589_s1 + $0x190] sm:$0xff] (!%p140_p9)  ;;  %v220_v19 = vld [vmem:[%s4589_s1 + $0x198] sm:$0xff] (!%p140_p9)  ;;  %v189_v23 = vld [vmem:[%s4589_s1 + $0xa0] sm:$0xff] (!%p140_p9)  ;;  %v3218_v6 = vsub.s32 (!%p140_p9), 1, %v3186_v57  ;;  %v3230_v11 = vsub.s32 (!%p140_p9), 3, %v3186_v57  ;;  %s1830_s17 = scalar_lea.sflag (!%p140_p9), [#allocation3], %s159_s29 }
  0x12   : > { %2456 = vmatprep.subr.bf16.mxu1 (!%p140_p9), %v2455_v8  ;;  %v203_v20 = vld [vmem:[%s4589_s1 + $0x110] sm:$0xff] (!%p140_p9)  ;;  %v2459_v21 = vpack.c.bf16 (!%p140_p9), %v220_v19, %v219_v18  ;;  %v204_v22 = vld [vmem:[%s4589_s1 + $0x118] sm:$0xff] (!%p140_p9)  ;;  %v190_v24 = vld [vmem:[%s4589_s1 + $0xa8] sm:$0xff] (!%p140_p9)  ;;  %2428 = vmatprep.subr.bf16.mxu0 (!%p140_p9), %v2427_v16  ;;  %v3297_v43 = vsub.s32 (!%p140_p9), 2, %v3186_v57  ;;  %s2926_s19 = scalar_lea.vmem (!%p140_p9), %s4548_s8, 16 }
  0x13   : > { %2458 = vmatpush3.bf16.msra.mxu1 (!%p140_p9), %v2457_v12  ;;  %v2461_v25 = vpack.c.bf16 (!%p140_p9), %v204_v22, %v203_v20  ;;  %v2431_v26 = vpack.c.bf16 (!%p140_p9), %v190_v24, %v189_v23  ;;  %v173_v27 = vld [vmem:[%s4589_s1 + $0x20] sm:$0xff] (!%p140_p9)  ;;  %v174_v28 = vld [vmem:[%s4589_s1 + $0x28] sm:$0xff] (!%p140_p9)  ;;  %v191_v35 = vld [vmem:[%s4589_s1 + $0xb0] sm:$0xff] (!%p140_p9)  ;;  %p2927_p11 = scmp.ne.s32.totalorder (!%p140_p9), %s4548_s8, %s2926_s19 }
  0x14   : > { %v221_v29 = vld [vmem:[%s4589_s1 + $0x1a0] sm:$0xff] (!%p140_p9)  ;;  %2460 = vmatprep.subr.bf16.mxu1 (!%p140_p9), %v2459_v21  ;;  %v222_v30 = vld [vmem:[%s4589_s1 + $0x1a8] sm:$0xff] (!%p140_p9)  ;;  %v2433_v33 = vpack.c.bf16 (!%p140_p9), %v174_v28, %v173_v27  ;;  %v192_v36 = vld [vmem:[%s4589_s1 + $0xb8] sm:$0xff] (!%p140_p9) }
  0x15   : > { %v205_v31 = vld [vmem:[%s4589_s1 + $0x120] sm:$0xff]  ;;  %v206_v32 = vld [vmem:[%s4589_s1 + $0x128] sm:$0xff]  ;;  %2430 = vmatpush3.bf16.msra.mxu0 %v2429_v17  ;;  %v2463_v34 = vpack.c.bf16 %v222_v30, %v221_v29  ;;  %v175_v37 = vld [vmem:[%s4589_s1 + $0x30] sm:$0xff]  ;;  %v2435_v39 = vpack.c.bf16 %v192_v36, %v191_v35  ;;  %s3156_s30 = scalar_select %p161_p10, %s3035_s16, 1 }
  0x16   : > { %2432 = vmatprep.subr.bf16.mxu0 %v2431_v26  ;;  %v2465_v38 = vpack.c.bf16 %v206_v32, %v205_v31  ;;  %v176_v40 = vld [vmem:[%s4589_s1 + $0x38] sm:$0xff]  ;;  %v223_v41 = vld [vmem:[%s4589_s1 + $0x1b0] sm:$0xff]  ;;  %v193_v47 = vld [vmem:[%s4589_s1 + $0xc0] sm:$0xff]  ;;  %p2928_p12 = pnand %p2927_p11, %p3052_p5  ;;  %s2993_s16 = smov [#allocation2]  }
  0x17   : > { %2462 = vmatpush3.bf16.msra.mxu1 %v2461_v25  ;;  %v224_v42 = vld [vmem:[%s4589_s1 + $0x1b8] sm:$0xff]  ;;  %v207_v45 = vld [vmem:[%s4589_s1 + $0x130] sm:$0xff]  ;;  %v194_v48 = vld [vmem:[%s4589_s1 + $0xc8] sm:$0xff]  ;;  %v2437_v49 = vpack.c.bf16 %v176_v40, %v175_v37  ;;  %s2883_s5 = smul.u32 29, %s3156_s30 }
  0x18   : > { %2464 = vmatprep.subr.bf16.mxu1 %v2463_v34  ;;  %v2467_v44 = vpack.c.bf16 %v224_v42, %v223_v41  ;;  %v208_v46 = vld [vmem:[%s4589_s1 + $0x138] sm:$0xff]  ;;  %v225_v50 = vld [vmem:[%s4589_s1 + $0x1c0] sm:$0xff]  ;;  %v226_v51 = vld [vmem:[%s4589_s1 + $0x1c8] sm:$0xff]  ;;  %v2439_v53 = vpack.c.bf16 %v194_v48, %v193_v47  ;;  %p2929_p13 = pneg %p2928_p12 }
  0x19   : > { %2434 = vmatpush3.bf16.msra.mxu0 %v2433_v33  ;;  %v2469_v52 = vpack.c.bf16 %v208_v46, %v207_v45  ;;  %v177_v54 = vld [vmem:[%s4589_s1 + $0x40] sm:$0xff]  ;;  %v178_v55 = vld [vmem:[%s4589_s1 + $0x48] sm:$0xff]  ;;  %v2471_v58 = vpack.c.bf16 %v226_v51, %v225_v50  ;;  %v195_v60 = vld [vmem:[%s4589_s1 + $0xd0] sm:$0xff]  ;;  %s3215_s7 = scalar_lea.vmem %s4588_s0, %s2883_s5 }
  0x1a   : > { %2436 = vmatprep.subr.bf16.mxu0 %v2435_v39  ;;  %v209_v56 = vld [vmem:[%s4589_s1 + $0x140] sm:$0xff]  ;;  %v210_v59 = vld [vmem:[%s4589_s1 + $0x148] sm:$0xff]  ;;  %v196_v61 = vld [vmem:[%s4589_s1 + $0xd8] sm:$0xff]  ;;  %v2441_v0 = vpack.c.bf16 %v178_v55, %v177_v54  ;;  %v3288_v39 = vsub.s32 0, %v3186_v57 }
  0x1b   : > { %2466 = vmatpush3.bf16.msra.mxu1 %v2465_v38  ;;  %v227_v62 = vld [vmem:[%s4589_s1 + $0x1d0] sm:$0xff]  ;;  %v228_v63 = vld [vmem:[%s4589_s1 + $0x1d8] sm:$0xff]  ;;  %v2473_v1 = vpack.c.bf16 %v210_v59, %v209_v56  ;;  %v2443_v2 = vpack.c.bf16 %v196_v61, %v195_v60  ;;  %v197_v9 = vld [vmem:[%s4589_s1 + $0xe0] sm:$0xff] }
  0x1c   : > { %2468 = vmatprep.subr.bf16.mxu1 %v2467_v44  ;;  %v179_v3 = vld [vmem:[%s4589_s1 + $0x50] sm:$0xff]  ;;  %v180_v4 = vld [vmem:[%s4589_s1 + $0x58] sm:$0xff]  ;;  %v2475_v7 = vpack.c.bf16 %v228_v63, %v227_v62  ;;  %v198_v10 = vld [vmem:[%s4589_s1 + $0xe8] sm:$0xff] }
  0x1d   : > { %2438 = vmatpush3.bf16.msra.mxu0 %v2437_v49  ;;  %v211_v5 = vld [vmem:[%s4589_s1 + $0x150] sm:$0xff]  ;;  %v212_v8 = vld [vmem:[%s4589_s1 + $0x158] sm:$0xff]  ;;  %v229_v12 = vld [vmem:[%s4589_s1 + $0x1e0] sm:$0xff]  ;;  %v2445_v14 = vpack.c.bf16 %v180_v4, %v179_v3  ;;  %v2447_v17 = vpack.c.bf16 %v198_v10, %v197_v9 }
  0x1e   : > { %2440 = vmatprep.subr.bf16.mxu0 %v2439_v53  ;;  %v230_v13 = vld [vmem:[%s4589_s1 + $0x1e8] sm:$0xff]  ;;  %v3239_v15 = vld [vmem:[%s3215_s7] sm:$0xff]  ;;  %v2477_v16 = vpack.c.bf16 %v212_v8, %v211_v5  ;;  %v199_v24 = vld [vmem:[%s4589_s1 + $0xf0] sm:$0xff]  ;;  %v3318_v53 = vsub.s32 5, %v3186_v57 }
  0x1f   : > { %2470 = vmatpush3.bf16.msra.mxu1 %v2469_v52  ;;  %v181_v18 = vld [vmem:[%s4589_s1 + $0x60] sm:$0xff]  ;;  %v182_v19 = vld [vmem:[%s4589_s1 + $0x68] sm:$0xff]  ;;  %v637_v21 = vrot.slane %v3239_v15, %v3218_v6  ;;  %v2479_v22 = vpack.c.bf16 %v230_v13, %v229_v12  ;;  %v200_v25 = vld [vmem:[%s4589_s1 + $0xf8] sm:$0xff]  ;;  %v645_v26 = vrot.slane %v3239_v15, %v3230_v11  ;;  %v633_v54 = vrot.slane %v3239_v15, %v3288_v39 }
  0x20   : > { %2472 = vmatprep.subr.bf16.mxu1 %v2471_v58  ;;  %v213_v20 = vld [vmem:[%s4589_s1 + $0x160] sm:$0xff]  ;;  %v214_v23 = vld [vmem:[%s4589_s1 + $0x168] sm:$0xff]  ;;  %v231_v27 = vld [vmem:[%s4589_s1 + $0x1f0] sm:$0xff]  ;;  %v2449_v29 = vpack.c.bf16 %v182_v19, %v181_v18  ;;  %v2451_v31 = vpack.c.bf16 %v200_v25, %v199_v24  ;;  %v3329_v58 = vsub.s32 7, %v3186_v57  ;;  %v641_v60 = vrot.slane %v3239_v15, %v3297_v43 }
  0x21   : > { %2442 = vmatpush3.bf16.msra.mxu0 %v2441_v0  ;;  %v232_v28 = vld [vmem:[%s4589_s1 + $0x1f8] sm:$0xff]  ;;  %841 = vmatprep.mubr.f32.mxu0 %v637_v21  ;;  %v2481_v30 = vpack.c.bf16 %v214_v23, %v213_v20  ;;  %v183_v32 = vld [vmem:[%s4589_s1 + $0x70] sm:$0xff]  ;;  %v249_v37 = vld [vmem:[%s4589_s1 + $0x280] sm:$0xff] }
  0x22   : > { %2444 = vmatprep.subr.bf16.mxu0 %v2443_v2  ;;  %911 = vmatprep.mubr.f32.mxu1 %v645_v26  ;;  %v184_v33 = vld [vmem:[%s4589_s1 + $0x78] sm:$0xff]  ;;  %v215_v34 = vld [vmem:[%s4589_s1 + $0x170] sm:$0xff]  ;;  %v2483_v35 = vpack.c.bf16 %v232_v28, %v231_v27  ;;  %v250_v38 = vld [vmem:[%s4589_s1 + $0x288] sm:$0xff]  ;;  %v661_v10 = vrot.slane %v3239_v15, %v3329_v58 }
  0x23   : > { %2474 = vmatpush3.bf16.msra.mxu1 %v2473_v1  ;;  %v216_v36 = vld [vmem:[%s4589_s1 + $0x178] sm:$0xff]  ;;  %v281_v40 = vld [vmem:[%s4589_s1 + $0x380] sm:$0xff]  ;;  %v282_v41 = vld [vmem:[%s4589_s1 + $0x388] sm:$0xff]  ;;  %v2453_v42 = vpack.c.bf16 %v184_v33, %v183_v32  ;;  %v2487_v45 = vpack.c.bf16 %v250_v38, %v249_v37 }
  0x24   : > { %2476 = vmatprep.subr.bf16.mxu1 %v2475_v7  ;;  %v2485_v44 = vpack.c.bf16 %v216_v36, %v215_v34  ;;  %v233_v46 = vld [vmem:[%s4589_s1 + $0x200] sm:$0xff]  ;;  %v234_v47 = vld [vmem:[%s4589_s1 + $0x208] sm:$0xff]  ;;  %v2519_v49 = vpack.c.bf16 %v282_v41, %v281_v40  ;;  %v251_v51 = vld [vmem:[%s4589_s1 + $0x290] sm:$0xff]  ;;  %v653_v7 = vrot.slane %v3239_v15, %v3318_v53 }
  0x25   : > { %2446 = vmatpush3.bf16.msra.mxu0 %v2445_v14  ;;  %v265_v48 = vld [vmem:[%s4589_s1 + $0x300] sm:$0xff]  ;;  %v266_v50 = vld [vmem:[%s4589_s1 + $0x308] sm:$0xff]  ;;  %v252_v52 = vld [vmem:[%s4589_s1 + $0x298] sm:$0xff]  ;;  %v2489_v59 = vpack.c.bf16 %v234_v47, %v233_v46 }
  0x26   : > { %2448 = vmatprep.subr.bf16.mxu0 %v2447_v17  ;;  %v283_v55 = vld [vmem:[%s4589_s1 + $0x390] sm:$0xff]  ;;  %v284_v56 = vld [vmem:[%s4589_s1 + $0x398] sm:$0xff]  ;;  %v2521_v61 = vpack.c.bf16 %v266_v50, %v265_v48  ;;  %v2491_v62 = vpack.c.bf16 %v252_v52, %v251_v51  ;;  %v253_v4 = vld [vmem:[%s4589_s1 + $0x2a0] sm:$0xff] }
  0x27   : > { %2478 = vmatpush3.bf16.msra.mxu1 %v2477_v16  ;;  %v235_v63 = vld [vmem:[%s4589_s1 + $0x210] sm:$0xff]  ;;  %v236_v0 = vld [vmem:[%s4589_s1 + $0x218] sm:$0xff]  ;;  %v2523_v2 = vpack.c.bf16 %v284_v56, %v283_v55  ;;  %v254_v5 = vld [vmem:[%s4589_s1 + $0x2a8] sm:$0xff] }
  0x28   : > { %2480 = vmatprep.subr.bf16.mxu1 %v2479_v22  ;;  %v267_v1 = vld [vmem:[%s4589_s1 + $0x310] sm:$0xff]  ;;  %v268_v3 = vld [vmem:[%s4589_s1 + $0x318] sm:$0xff]  ;;  %v285_v8 = vld [vmem:[%s4589_s1 + $0x3a0] sm:$0xff]  ;;  %v2493_v12 = vpack.c.bf16 %v236_v0, %v235_v63  ;;  %v2495_v14 = vpack.c.bf16 %v254_v5, %v253_v4 }
  0x29   : > { %2450 = vmatpush3.bf16.msra.mxu0 %v2449_v29  ;;  %v286_v9 = vld [vmem:[%s4589_s1 + $0x3a8] sm:$0xff]  ;;  %v2525_v13 = vpack.c.bf16 %v268_v3, %v267_v1  ;;  %v237_v16 = vld [vmem:[%s4589_s1 + $0x220] sm:$0xff]  ;;  %v255_v21 = vld [vmem:[%s4589_s1 + $0x2b0] sm:$0xff] }
  0x2a   : > { %2452 = vmatprep.subr.bf16.mxu0 %v2451_v31  ;;  %v238_v17 = vld [vmem:[%s4589_s1 + $0x228] sm:$0xff]  ;;  %v269_v18 = vld [vmem:[%s4589_s1 + $0x320] sm:$0xff]  ;;  %v2527_v19 = vpack.c.bf16 %v286_v9, %v285_v8  ;;  %v256_v22 = vld [vmem:[%s4589_s1 + $0x2b8] sm:$0xff] }
  0x2b   : > { %2482 = vmatpush3.bf16.msra.mxu1 %v2481_v30  ;;  %v270_v20 = vld [vmem:[%s4589_s1 + $0x328] sm:$0xff]  ;;  %v287_v23 = vld [vmem:[%s4589_s1 + $0x3b0] sm:$0xff]  ;;  %v288_v24 = vld [vmem:[%s4589_s1 + $0x3b8] sm:$0xff]  ;;  %v2497_v25 = vpack.c.bf16 %v238_v17, %v237_v16  ;;  %v2499_v27 = vpack.c.bf16 %v256_v22, %v255_v21 }
  0x2c   : > { %2484 = vmatprep.subr.bf16.mxu1 %v2483_v35  ;;  %v2529_v26 = vpack.c.bf16 %v270_v20, %v269_v18  ;;  %v239_v28 = vld [vmem:[%s4589_s1 + $0x230] sm:$0xff]  ;;  %v240_v29 = vld [vmem:[%s4589_s1 + $0x238] sm:$0xff]  ;;  %v2531_v31 = vpack.c.bf16 %v288_v24, %v287_v23  ;;  %v257_v33 = vld [vmem:[%s4589_s1 + $0x2c0] sm:$0xff] }
  0x2d   : > { %2454 = vmatpush3.bf16.msra.mxu0 %v2453_v42  ;;  %v271_v30 = vld [vmem:[%s4589_s1 + $0x330] sm:$0xff]  ;;  %v272_v32 = vld [vmem:[%s4589_s1 + $0x338] sm:$0xff]  ;;  %v258_v34 = vld [vmem:[%s4589_s1 + $0x2c8] sm:$0xff]  ;;  %v2501_v37 = vpack.c.bf16 %v240_v29, %v239_v28 }
  0x2e   : > { %2488 = vmatprep.subr.bf16.mxu0 %v2487_v45  ;;  %v289_v35 = vld [vmem:[%s4589_s1 + $0x3c0] sm:$0xff]  ;;  %v290_v36 = vld [vmem:[%s4589_s1 + $0x3c8] sm:$0xff]  ;;  %v2533_v38 = vpack.c.bf16 %v272_v32, %v271_v30  ;;  %v2503_v40 = vpack.c.bf16 %v258_v34, %v257_v33  ;;  %v259_v47 = vld [vmem:[%s4589_s1 + $0x2d0] sm:$0xff] }
  0x2f   : > { %2486 = vmatpush3.bf16.msra.mxu1 %v2485_v44  ;;  %v241_v41 = vld [vmem:[%s4589_s1 + $0x240] sm:$0xff]  ;;  %v242_v42 = vld [vmem:[%s4589_s1 + $0x248] sm:$0xff]  ;;  %v2535_v45 = vpack.c.bf16 %v290_v36, %v289_v35  ;;  %v260_v48 = vld [vmem:[%s4589_s1 + $0x2d8] sm:$0xff] }
  0x30   : > { %2520 = vmatprep.subr.bf16.mxu1 %v2519_v49  ;;  %842 = vmatmul.mubr.f32.vlgmr.msra.gmra.mrb[0].mxu0 %v633_v54  ;;  %v273_v44 = vld [vmem:[%s4589_s1 + $0x340] sm:$0xff]  ;;  %v274_v46 = vld [vmem:[%s4589_s1 + $0x348] sm:$0xff]  ;;  %v291_v49 = vld [vmem:[%s4589_s1 + $0x3d0] sm:$0xff]  ;;  %v2505_v51 = vpack.c.bf16 %v242_v42, %v241_v41  ;;  %v2507_v54 = vpack.c.bf16 %v260_v48, %v259_v47 }
  0x31   : > { %2490 = vmatpush3.bf16.msra.mxu0 %v2489_v59  ;;  %981 = vmatprep.mubr.f32.mxu0 %v653_v7  ;;  %v292_v50 = vld [vmem:[%s4589_s1 + $0x3d8] sm:$0xff]  ;;  %v2537_v52 = vpack.c.bf16 %v274_v46, %v273_v44  ;;  %v243_v55 = vld [vmem:[%s4589_s1 + $0x250] sm:$0xff]  ;;  %v262_v63 = vld [vmem:[%s4589_s1 + $0x2e8] sm:$0xff] }
  0x32   : > { %912 = vmatmul.mubr.f32.vlgmr.msra.gmra.mrb[0].mxu1 %v641_v60  ;;  %2492 = vmatprep.subr.bf16.mxu0 %v2491_v62  ;;  %v244_v56 = vld [vmem:[%s4589_s1 + $0x258] sm:$0xff]  ;;  %v275_v59 = vld [vmem:[%s4589_s1 + $0x350] sm:$0xff]  ;;  %v2539_v60 = vpack.c.bf16 %v292_v50, %v291_v49  ;;  %v261_v62 = vld [vmem:[%s4589_s1 + $0x2e0] sm:$0xff] }
  0x33   : > { %2522 = vmatpush3.bf16.msra.mxu1 %v2521_v61  ;;  %1051 = vmatprep.mubr.f32.mxu1 %v661_v10  ;;  %v276_v61 = vld [vmem:[%s4589_s1 + $0x358] sm:$0xff]  ;;  %v293_v0 = vld [vmem:[%s4589_s1 + $0x3e0] sm:$0xff]  ;;  %v294_v1 = vld [vmem:[%s4589_s1 + $0x3e8] sm:$0xff]  ;;  %v2511_v4 = vpack.c.bf16 %v262_v63, %v261_v62 }
  0x34   : > { %2524 = vmatprep.subr.bf16.mxu1 %v2523_v2  ;;  %v2509_v2 = vpack.c.bf16 %v244_v56, %v243_v55  ;;  %v2541_v3 = vpack.c.bf16 %v276_v61, %v275_v59  ;;  %v245_v5 = vld [vmem:[%s4589_s1 + $0x260] sm:$0xff]  ;;  %v246_v7 = vld [vmem:[%s4589_s1 + $0x268] sm:$0xff]  ;;  %v2543_v9 = vpack.c.bf16 %v294_v1, %v293_v0  ;;  %v296_v16 = vld [vmem:[%s4589_s1 + $0x3f8] sm:$0xff] }
  0x35   : > { %2494 = vmatpush3.bf16.msra.mxu0 %v2493_v12  ;;  %v277_v8 = vld [vmem:[%s4589_s1 + $0x360] sm:$0xff]  ;;  %v278_v10 = vld [vmem:[%s4589_s1 + $0x368] sm:$0xff]  ;;  %v263_v12 = vld [vmem:[%s4589_s1 + $0x2f0] sm:$0xff]  ;;  %v2513_v17 = vpack.c.bf16 %v246_v7, %v245_v5 }
  0x36   : > { %2496 = vmatprep.subr.bf16.mxu0 %v2495_v14  ;;  %v295_v14 = vld [vmem:[%s4589_s1 + $0x3f0] sm:$0xff]  ;;  %v2545_v18 = vpack.c.bf16 %v278_v10, %v277_v8  ;;  %v248_v21 = vld [vmem:[%s4589_s1 + $0x278] sm:$0xff]  ;;  %v345_v28 = vld [vmem:[%s4589_s1 + $0x580] sm:$0xff] }
  0x37   : > { %2526 = vmatpush3.bf16.msra.mxu1 %v2525_v13  ;;  %v264_v13 = vld [vmem:[%s4589_s1 + $0x2f8] sm:$0xff]  ;;  %v247_v20 = vld [vmem:[%s4589_s1 + $0x270] sm:$0xff]  ;;  %v2547_v23 = vpack.c.bf16 %v296_v16, %v295_v14  ;;  %v346_v29 = vld [vmem:[%s4589_s1 + $0x588] sm:$0xff] }
  0x38   : > { %2528 = vmatprep.subr.bf16.mxu1 %v2527_v19  ;;  %v2515_v19 = vpack.c.bf16 %v264_v13, %v263_v12  ;;  %v279_v22 = vld [vmem:[%s4589_s1 + $0x370] sm:$0xff]  ;;  %v280_v24 = vld [vmem:[%s4589_s1 + $0x378] sm:$0xff]  ;;  %v2517_v30 = vpack.c.bf16 %v248_v21, %v247_v20  ;;  %v297_v34 = vld [vmem:[%s4589_s1 + $0x400] sm:$0xff] }
  0x39   : > { %2498 = vmatpush3.bf16.msra.mxu0 %v2497_v25  ;;  %v313_v25 = vld [vmem:[%s4589_s1 + $0x480] sm:$0xff]  ;;  %v2549_v32 = vpack.c.bf16 %v280_v24, %v279_v22  ;;  %v298_v35 = vld [vmem:[%s4589_s1 + $0x408] sm:$0xff]  ;;  %v347_v42 = vld [vmem:[%s4589_s1 + $0x590] sm:$0xff] }
  0x3a   : > { %2500 = vmatprep.subr.bf16.mxu0 %v2499_v27  ;;  %v3500_v27 = vsub.s32 4, %v3186_v57  ;;  %v329_v36 = vld [vmem:[%s4589_s1 + $0x500] sm:$0xff]  ;;  %v348_v44 = vld [vmem:[%s4589_s1 + $0x598] sm:$0xff]  ;;  %v2553_v46 = vpack.c.bf16 %v298_v35, %v297_v34  ;;  %v299_v50 = vld [vmem:[%s4589_s1 + $0x410] sm:$0xff] }
  0x3b   : > { %2530 = vmatpush3.bf16.msra.mxu1 %v2529_v26  ;;  %v314_v26 = vld [vmem:[%s4589_s1 + $0x488] sm:$0xff]  ;;  %v317_v55 = vld [vmem:[%s4589_s1 + $0x4a0] sm:$0xff]  ;;  %v319_v8 = vld [vmem:[%s4589_s1 + $0x4b0] sm:$0xff] }
  0x3c   : > { %2532 = vmatprep.subr.bf16.mxu1 %v2531_v31  ;;  %v3509_v31 = vsub.s32 6, %v3186_v57  ;;  %v2551_v33 = vpack.c.bf16 %v314_v26, %v313_v25  ;;  %v2583_v57 = vpack.c.bf16 %v346_v29, %v345_v28  ;;  %v649_v41 = vrot.slane %v3239_v15, %v3500_v27  ;;  %v318_v56 = vld [vmem:[%s4589_s1 + $0x4a8] sm:$0xff]  ;;  %v351_v10 = vld [vmem:[%s4589_s1 + $0x5b0] sm:$0xff]  ;;  %v352_v12 = vld [vmem:[%s4589_s1 + $0x5b8] sm:$0xff] }
  0x3d   : > { %2502 = vmatpush3.bf16.msra.mxu0 %v2501_v37  ;;  %v330_v37 = vld [vmem:[%s4589_s1 + $0x508] sm:$0xff]  ;;  %v2559_v1 = vpack.c.bf16 %v318_v56, %v317_v55  ;;  %v2595_v20 = vpack.c.bf16 %v352_v12, %v351_v10  ;;  %v336_v21 = vld [vmem:[%s4589_s1 + $0x538] sm:$0xff]  ;;  %v321_v22 = vld [vmem:[%s4589_s1 + $0x4c0] sm:$0xff] }
  0x3e   : > { %2504 = vmatprep.subr.bf16.mxu0 %v2503_v40  ;;  %v316_v40 = vld [vmem:[%s4589_s1 + $0x498] sm:$0xff]  ;;  %v657_v47 = vrot.slane %v3239_v15, %v3509_v31  ;;  %v2585_v48 = vpack.c.bf16 %v330_v37, %v329_v36  ;;  %v350_v61 = vld [vmem:[%s4589_s1 + $0x5a8] sm:$0xff]  ;;  %v353_v24 = vld [vmem:[%s4589_s1 + $0x5c0] sm:$0xff] }
  0x3f   : > { %2534 = vmatpush3.bf16.msra.mxu1 %v2533_v38  ;;  %v315_v38 = vld [vmem:[%s4589_s1 + $0x490] sm:$0xff]  ;;  %v332_v15 = vld [vmem:[%s4589_s1 + $0x518] sm:$0xff]  ;;  %v334_v7 = vld [vmem:[%s4589_s1 + $0x528] sm:$0xff] }
  0x40   : > { %2536 = vmatprep.subr.bf16.mxu1 %v2535_v45  ;;  %v3538_v45 = vld [vmem:[%s3215_s7 + $0x8] sm:$0xff]  ;;  %v2555_v49 = vpack.c.bf16 %v316_v40, %v315_v38  ;;  %v323_v36 = vld [vmem:[%s4589_s1 + $0x4d0] sm:$0xff]  ;;  %v356_v38 = vld [vmem:[%s4589_s1 + $0x5d8] sm:$0xff] }
  0x41   : > { %2506 = vmatpush3.bf16.msra.mxu0 %v2505_v51  ;;  %v300_v51 = vld [vmem:[%s4589_s1 + $0x418] sm:$0xff]  ;;  %v669_v59 = vrot.slane %v3538_v45, %v3218_v6  ;;  %v677_v62 = vrot.slane %v3538_v45, %v3230_v11  ;;  %v354_v25 = vld [vmem:[%s4589_s1 + $0x5c8] sm:$0xff]  ;;  %v355_v37 = vld [vmem:[%s4589_s1 + $0x5d0] sm:$0xff] }
  0x42   : > { %2508 = vmatprep.subr.bf16.mxu0 %v2507_v54  ;;  %v2587_v54 = vpack.c.bf16 %v348_v44, %v347_v42  ;;  %v2557_v63 = vpack.c.bf16 %v300_v51, %v299_v50  ;;  %v2599_v34 = vpack.c.bf16 %v354_v25, %v353_v24  ;;  %v338_v35 = vld [vmem:[%s4589_s1 + $0x548] sm:$0xff]  ;;  %v307_v44 = vld [vmem:[%s4589_s1 + $0x450] sm:$0xff]  ;;  %v325_v50 = vld [vmem:[%s4589_s1 + $0x4e0] sm:$0xff] }
  0x43   : > { %2538 = vmatpush3.bf16.msra.mxu1 %v2537_v52  ;;  %v331_v52 = vld [vmem:[%s4589_s1 + $0x510] sm:$0xff]  ;;  %v326_v51 = vld [vmem:[%s4589_s1 + $0x4e8] sm:$0xff]  ;;  %v393_v24 = vld [vmem:[%s4589_s1 + $0x700] sm:$0xff] }
  0x44   : > { %2540 = vmatprep.subr.bf16.mxu1 %v2539_v60  ;;  %v349_v60 = vld [vmem:[%s4589_s1 + $0x5a0] sm:$0xff]  ;;  %v2589_v0 = vpack.c.bf16 %v332_v15, %v331_v52  ;;  %v2575_v56 = vpack.c.bf16 %v326_v51, %v325_v50  ;;  %v343_v10 = vld [vmem:[%s4589_s1 + $0x570] sm:$0xff]  ;;  %v693_v50 = vrot.slane %v3538_v45, %v3329_v58 }
  0x45   : > { %2510 = vmatpush3.bf16.msra.mxu0 %v2509_v2  ;;  %v301_v2 = vld [vmem:[%s4589_s1 + $0x420] sm:$0xff]  ;;  %v2591_v5 = vpack.c.bf16 %v350_v61, %v349_v60  ;;  %v310_v60 = vld [vmem:[%s4589_s1 + $0x468] sm:$0xff] }
  0x46   : > { %2512 = vmatprep.subr.bf16.mxu0 %v2511_v4  ;;  %v333_v4 = vld [vmem:[%s4589_s1 + $0x520] sm:$0xff] }
  0x47   : > { %2542 = vmatpush3.bf16.msra.mxu1 %v2541_v3  ;;  %v302_v3 = vld [vmem:[%s4589_s1 + $0x428] sm:$0xff]  ;;  %v2593_v14 = vpack.c.bf16 %v334_v7, %v333_v4  ;;  %v357_v52 = vld [vmem:[%s4589_s1 + $0x5e0] sm:$0xff] }
  0x48   : > { %2544 = vmatprep.subr.bf16.mxu1 %v2543_v9  ;;  %v320_v9 = vld [vmem:[%s4589_s1 + $0x4b8] sm:$0xff]  ;;  %v2561_v13 = vpack.c.bf16 %v302_v3, %v301_v2  ;;  %v341_v61 = vld [vmem:[%s4589_s1 + $0x560] sm:$0xff]  ;;  %v359_v2 = vld [vmem:[%s4589_s1 + $0x5f0] sm:$0xff] }
  0x49   : > { %2514 = vmatpush3.bf16.msra.mxu0 %v2513_v17  ;;  %v2563_v16 = vpack.c.bf16 %v320_v9, %v319_v8  ;;  %v303_v17 = vld [vmem:[%s4589_s1 + $0x430] sm:$0xff]  ;;  %v360_v3 = vld [vmem:[%s4589_s1 + $0x5f8] sm:$0xff] }
  0x4a   : > { %2516 = vmatprep.subr.bf16.mxu0 %v2515_v19  ;;  %v335_v19 = vld [vmem:[%s4589_s1 + $0x530] sm:$0xff]  ;;  %v312_v9 = vld [vmem:[%s4589_s1 + $0x478] sm:$0xff]  ;;  %v2611_v12 = vpack.c.bf16 %v360_v3, %v359_v2 }
  0x4b   : > { %2546 = vmatpush3.bf16.msra.mxu1 %v2545_v18  ;;  %v304_v18 = vld [vmem:[%s4589_s1 + $0x438] sm:$0xff]  ;;  %v2597_v28 = vpack.c.bf16 %v336_v21, %v335_v19  ;;  %v311_v8 = vld [vmem:[%s4589_s1 + $0x470] sm:$0xff] }
  0x4c   : > { %2548 = vmatprep.subr.bf16.mxu1 %v2547_v23  ;;  %v322_v23 = vld [vmem:[%s4589_s1 + $0x4c8] sm:$0xff]  ;;  %v2565_v26 = vpack.c.bf16 %v304_v18, %v303_v17  ;;  %v409_v17 = vld [vmem:[%s4589_s1 + $0x780] sm:$0xff]  ;;  %v2581_v19 = vpack.c.bf16 %v312_v9, %v311_v8  ;;  %v400_v9 = vld [vmem:[%s4589_s1 + $0x738] sm:$0xff] }
  0x4d   : > { %2518 = vmatpush3.bf16.msra.mxu0 %v2517_v30  ;;  %v2567_v29 = vpack.c.bf16 %v322_v23, %v321_v22  ;;  %v305_v30 = vld [vmem:[%s4589_s1 + $0x440] sm:$0xff]  ;;  %v410_v18 = vld [vmem:[%s4589_s1 + $0x788] sm:$0xff] }
  0x4e   : > { %2552 = vmatprep.subr.bf16.mxu0 %v2551_v33  ;;  %v337_v33 = vld [vmem:[%s4589_s1 + $0x540] sm:$0xff]  ;;  %v362_v23 = vld [vmem:[%s4589_s1 + $0x608] sm:$0xff]  ;;  %v2647_v25 = vpack.c.bf16 %v410_v18, %v409_v17 }
  0x4f   : > { %2550 = vmatpush3.bf16.msra.mxu1 %v2549_v32  ;;  %v306_v32 = vld [vmem:[%s4589_s1 + $0x448] sm:$0xff]  ;;  %v361_v22 = vld [vmem:[%s4589_s1 + $0x600] sm:$0xff] }
  0x50   : > { %2584 = vmatprep.subr.bf16.mxu1 %v2583_v57  ;;  %982 = vmatmul.mubr.f32.vlgmr.msra.gmra.mrb[2].mxu0 %v649_v41  ;;  %v324_v57 = vld [vmem:[%s4589_s1 + $0x4d8] sm:$0xff]  ;;  %v2569_v40 = vpack.c.bf16 %v306_v32, %v305_v30  ;;  %v2601_v41 = vpack.c.bf16 %v338_v35, %v337_v33  ;;  %v665_v30 = vrot.slane %v3538_v45, %v3288_v39  ;;  %v411_v32 = vld [vmem:[%s4589_s1 + $0x790] sm:$0xff] }
  0x51   : > { %2554 = vmatpush3.bf16.msra.mxu0 %v2553_v46  ;;  %1121 = vmatprep.mubr.f32.mxu0 %v669_v59  ;;  %v2571_v42 = vpack.c.bf16 %v324_v57, %v323_v36  ;;  %v308_v46 = vld [vmem:[%s4589_s1 + $0x458] sm:$0xff]  ;;  %v309_v59 = vld [vmem:[%s4589_s1 + $0x460] sm:$0xff]  ;;  %v673_v35 = vrot.slane %v3538_v45, %v3297_v43 }
  0x52   : > { %1052 = vmatmul.mubr.f32.vlgmr.msra.gmra.mrb[2].mxu1 %v657_v47  ;;  %2556 = vmatprep.subr.bf16.mxu0 %v2555_v49  ;;  %v339_v47 = vld [vmem:[%s4589_s1 + $0x550] sm:$0xff]  ;;  %v340_v49 = vld [vmem:[%s4589_s1 + $0x558] sm:$0xff]  ;;  %v2573_v15 = vpack.c.bf16 %v308_v46, %v307_v44  ;;  %v2577_v4 = vpack.c.bf16 %v310_v60, %v309_v59  ;;  %v381_v44 = vld [vmem:[%s4589_s1 + $0x6a0] sm:$0xff] }
  0x53   : > { %2586 = vmatpush3.bf16.msra.mxu1 %v2585_v48  ;;  %1191 = vmatprep.mubr.f32.mxu1 %v677_v62  ;;  %v2603_v48 = vpack.c.bf16 %v356_v38, %v355_v37  ;;  %v2605_v55 = vpack.c.bf16 %v340_v49, %v339_v47  ;;  %v412_v33 = vld [vmem:[%s4589_s1 + $0x798] sm:$0xff]  ;;  %v363_v37 = vld [vmem:[%s4589_s1 + $0x610] sm:$0xff]  ;;  %v382_v46 = vld [vmem:[%s4589_s1 + $0x6a8] sm:$0xff]  ;;  %v685_v47 = vrot.slane %v3538_v45, %v3318_v53 }
  0x54   : > { %2588 = vmatprep.subr.bf16.mxu1 %v2587_v54  ;;  %v358_v54 = vld [vmem:[%s4589_s1 + $0x5e8] sm:$0xff]  ;;  %v364_v38 = vld [vmem:[%s4589_s1 + $0x618] sm:$0xff] }
  0x55   : > { %2558 = vmatpush3.bf16.msra.mxu0 %v2557_v63  ;;  %v2607_v62 = vpack.c.bf16 %v358_v54, %v357_v52  ;;  %v342_v63 = vld [vmem:[%s4589_s1 + $0x568] sm:$0xff]  ;;  %v2621_v51 = vpack.c.bf16 %v364_v38, %v363_v37  ;;  %v2623_v54 = vpack.c.bf16 %v382_v46, %v381_v44  ;;  %v389_v37 = vld [vmem:[%s4589_s1 + $0x6e0] sm:$0xff] }
  0x56   : > { %2560 = vmatprep.subr.bf16.mxu0 %v2559_v1  ;;  %v328_v1 = vld [vmem:[%s4589_s1 + $0x4f8] sm:$0xff]  ;;  %v414_v49 = vld [vmem:[%s4589_s1 + $0x7a8] sm:$0xff] }
  0x57   : > { %2590 = vmatpush3.bf16.msra.mxu1 %v2589_v0  ;;  %v327_v0 = vld [vmem:[%s4589_s1 + $0x4f0] sm:$0xff]  ;;  %v398_v60 = vld [vmem:[%s4589_s1 + $0x728] sm:$0xff] }
  0x58   : > { %2592 = vmatprep.subr.bf16.mxu1 %v2591_v5  ;;  %v2609_v5 = vpack.c.bf16 %v342_v63, %v341_v61  ;;  %v2579_v7 = vpack.c.bf16 %v328_v1, %v327_v0  ;;  %v383_v61 = vld [vmem:[%s4589_s1 + $0x6b0] sm:$0xff]  ;;  %v416_v0 = vld [vmem:[%s4589_s1 + $0x7b8] sm:$0xff]  ;;  %v390_v38 = vld [vmem:[%s4589_s1 + $0x6e8] sm:$0xff] }
  0x59   : > { %2562 = vmatpush3.bf16.msra.mxu0 %v2561_v13  ;;  %v344_v13 = vld [vmem:[%s4589_s1 + $0x578] sm:$0xff]  ;;  %v415_v63 = vld [vmem:[%s4589_s1 + $0x7b0] sm:$0xff]  ;;  %v2639_v46 = vpack.c.bf16 %v390_v38, %v389_v37 }
  0x5a   : > { %2564 = vmatprep.subr.bf16.mxu0 %v2563_v16  ;;  %v378_v16 = vld [vmem:[%s4589_s1 + $0x688] sm:$0xff]  ;;  %v2659_v8 = vpack.c.bf16 %v416_v0, %v415_v63  ;;  %v407_v63 = vld [vmem:[%s4589_s1 + $0x770] sm:$0xff] }
  0x5b   : > { %2594 = vmatpush3.bf16.msra.mxu1 %v2593_v14  ;;  %v377_v14 = vld [vmem:[%s4589_s1 + $0x680] sm:$0xff] }
  0x5c   : > { %2596 = vmatprep.subr.bf16.mxu1 %v2595_v20  ;;  %v2613_v20 = vpack.c.bf16 %v344_v13, %v343_v10  ;;  %v2615_v21 = vpack.c.bf16 %v378_v16, %v377_v14  ;;  %v385_v10 = vld [vmem:[%s4589_s1 + $0x6c0] sm:$0xff]  ;;  %v418_v14 = vld [vmem:[%s4589_s1 + $0x7c8] sm:$0xff] }
  0x5d   : > { %2566 = vmatpush3.bf16.msra.mxu0 %v2565_v26  ;;  %v394_v26 = vld [vmem:[%s4589_s1 + $0x708] sm:$0xff]  ;;  %v417_v13 = vld [vmem:[%s4589_s1 + $0x7c0] sm:$0xff] }
  0x5e   : > { %2568 = vmatprep.subr.bf16.mxu0 %v2567_v29  ;;  %v380_v29 = vld [vmem:[%s4589_s1 + $0x698] sm:$0xff]  ;;  %v2649_v36 = vpack.c.bf16 %v394_v26, %v393_v24  ;;  %v387_v24 = vld [vmem:[%s4589_s1 + $0x6d0] sm:$0xff] }
  0x5f   : > { %2598 = vmatpush3.bf16.msra.mxu1 %v2597_v28  ;;  %v379_v28 = vld [vmem:[%s4589_s1 + $0x690] sm:$0xff] }
  0x60   : > { %2600 = vmatprep.subr.bf16.mxu1 %v2599_v34  ;;  %v2617_v34 = vpack.c.bf16 %v362_v23, %v361_v22  ;;  %v2619_v57 = vpack.c.bf16 %v380_v29, %v379_v28  ;;  %v2663_v22 = vpack.c.bf16 %v418_v14, %v417_v13  ;;  %v402_v23 = vld [vmem:[%s4589_s1 + $0x748] sm:$0xff]  ;;  %v419_v26 = vld [vmem:[%s4589_s1 + $0x7d0] sm:$0xff]  ;;  %v420_v28 = vld [vmem:[%s4589_s1 + $0x7d8] sm:$0xff] }
  0x61   : > { %2570 = vmatpush3.bf16.msra.mxu0 %v2569_v40  ;;  %v395_v40 = vld [vmem:[%s4589_s1 + $0x710] sm:$0xff]  ;;  %v457_v13 = vld [vmem:[%s4589_s1 + $0x900] sm:$0xff] }
  0x62   : > { %2572 = vmatprep.subr.bf16.mxu0 %v2571_v42  ;;  %v396_v42 = vld [vmem:[%s4589_s1 + $0x718] sm:$0xff] }
  0x63   : > { %2602 = vmatpush3.bf16.msra.mxu1 %v2601_v41  ;;  %v2651_v41 = vpack.c.bf16 %v412_v33, %v411_v32  ;;  %v2653_v52 = vpack.c.bf16 %v396_v42, %v395_v40  ;;  %v371_v33 = vld [vmem:[%s4589_s1 + $0x650] sm:$0xff]  ;;  %v421_v40 = vld [vmem:[%s4589_s1 + $0x7e0] sm:$0xff] }
  0x64   : > { %2604 = vmatprep.subr.bf16.mxu1 %v2603_v48  ;;  %v413_v48 = vld [vmem:[%s4589_s1 + $0x7a0] sm:$0xff] }
  0x65   : > { %2574 = vmatpush3.bf16.msra.mxu0 %v2573_v15  ;;  %v365_v15 = vld [vmem:[%s4589_s1 + $0x620] sm:$0xff]  ;;  %v2655_v59 = vpack.c.bf16 %v414_v49, %v413_v48  ;;  %v374_v48 = vld [vmem:[%s4589_s1 + $0x668] sm:$0xff] }
  0x66   : > { %2576 = vmatprep.subr.bf16.mxu0 %v2575_v56  ;;  %v397_v56 = vld [vmem:[%s4589_s1 + $0x720] sm:$0xff] }
  0x67   : > { %2606 = vmatpush3.bf16.msra.mxu1 %v2605_v55  ;;  %v366_v55 = vld [vmem:[%s4589_s1 + $0x628] sm:$0xff]  ;;  %v2657_v2 = vpack.c.bf16 %v398_v60, %v397_v56  ;;  %v405_v49 = vld [vmem:[%s4589_s1 + $0x760] sm:$0xff] }
  0x68   : > { %2608 = vmatprep.subr.bf16.mxu1 %v2607_v62  ;;  %v384_v62 = vld [vmem:[%s4589_s1 + $0x6b8] sm:$0xff]  ;;  %v2625_v1 = vpack.c.bf16 %v366_v55, %v365_v15  ;;  %v423_v15 = vld [vmem:[%s4589_s1 + $0x7f0] sm:$0xff] }
  0x69   : > { %2578 = vmatpush3.bf16.msra.mxu0 %v2577_v4  ;;  %v2627_v3 = vpack.c.bf16 %v384_v62, %v383_v61  ;;  %v367_v4 = vld [vmem:[%s4589_s1 + $0x630] sm:$0xff]  ;;  %v424_v55 = vld [vmem:[%s4589_s1 + $0x7f8] sm:$0xff] }
  0x6a   : > { %2580 = vmatprep.subr.bf16.mxu0 %v2579_v7  ;;  %v399_v7 = vld [vmem:[%s4589_s1 + $0x730] sm:$0xff]  ;;  %v376_v62 = vld [vmem:[%s4589_s1 + $0x678] sm:$0xff]  ;;  %v2675_v0 = vpack.c.bf16 %v424_v55, %v423_v15 }
  0x6b   : > { %2610 = vmatpush3.bf16.msra.mxu1 %v2609_v5  ;;  %v368_v5 = vld [vmem:[%s4589_s1 + $0x638] sm:$0xff]  ;;  %v2661_v17 = vpack.c.bf16 %v400_v9, %v399_v7  ;;  %v375_v61 = vld [vmem:[%s4589_s1 + $0x670] sm:$0xff] }
  0x6c   : > { %2612 = vmatprep.subr.bf16.mxu1 %v2611_v12  ;;  %v386_v12 = vld [vmem:[%s4589_s1 + $0x6c8] sm:$0xff]  ;;  %v2629_v16 = vpack.c.bf16 %v368_v5, %v367_v4  ;;  %v473_v4 = vld [vmem:[%s4589_s1 + $0x980] sm:$0xff]  ;;  %v2645_v7 = vpack.c.bf16 %v376_v62, %v375_v61  ;;  %v464_v62 = vld [vmem:[%s4589_s1 + $0x938] sm:$0xff] }
  0x6d   : > { %2582 = vmatpush3.bf16.msra.mxu0 %v2581_v19  ;;  %v2631_v18 = vpack.c.bf16 %v386_v12, %v385_v10  ;;  %v369_v19 = vld [vmem:[%s4589_s1 + $0x640] sm:$0xff]  ;;  %v474_v5 = vld [vmem:[%s4589_s1 + $0x988] sm:$0xff] }
  0x6e   : > { %2616 = vmatprep.subr.bf16.mxu0 %v2615_v21  ;;  %v401_v21 = vld [vmem:[%s4589_s1 + $0x740] sm:$0xff]  ;;  %v426_v12 = vld [vmem:[%s4589_s1 + $0x808] sm:$0xff]  ;;  %v2711_v14 = vpack.c.bf16 %v474_v5, %v473_v4 }
  0x6f   : > { %2614 = vmatpush3.bf16.msra.mxu1 %v2613_v20  ;;  %v370_v20 = vld [vmem:[%s4589_s1 + $0x648] sm:$0xff]  ;;  %v425_v10 = vld [vmem:[%s4589_s1 + $0x800] sm:$0xff] }
  0x70   : > { %2648 = vmatprep.subr.bf16.mxu1 %v2647_v25  ;;  %1122 = vmatmul.mubr.f32.vlgmr.msra.gmra.mrb[4].mxu0 %v665_v30  ;;  %v388_v25 = vld [vmem:[%s4589_s1 + $0x6d8] sm:$0xff]  ;;  %v2633_v29 = vpack.c.bf16 %v370_v20, %v369_v19  ;;  %v2665_v30 = vpack.c.bf16 %v402_v23, %v401_v21  ;;  %v681_v19 = vrot.slane %v3538_v45, %v3500_v27  ;;  %v475_v20 = vld [vmem:[%s4589_s1 + $0x990] sm:$0xff] }
  0x71   : > { %2618 = vmatpush3.bf16.msra.mxu0 %v2617_v34  ;;  %1261 = vmatprep.mubr.f32.mxu0 %v685_v47  ;;  %v2635_v32 = vpack.c.bf16 %v388_v25, %v387_v24  ;;  %v372_v34 = vld [vmem:[%s4589_s1 + $0x658] sm:$0xff]  ;;  %v373_v47 = vld [vmem:[%s4589_s1 + $0x660] sm:$0xff]  ;;  %v2681_v23 = vpack.c.bf16 %v426_v12, %v425_v10  ;;  %v689_v24 = vrot.slane %v3538_v45, %v3509_v31  ;;  %v466_v12 = vld [vmem:[%s4589_s1 + $0x948] sm:$0xff] }
  0x72   : > { %1192 = vmatmul.mubr.f32.vlgmr.msra.gmra.mrb[4].mxu1 %v673_v35  ;;  %2620 = vmatprep.subr.bf16.mxu0 %v2619_v57  ;;  %v403_v35 = vld [vmem:[%s4589_s1 + $0x750] sm:$0xff]  ;;  %v404_v57 = vld [vmem:[%s4589_s1 + $0x758] sm:$0xff]  ;;  %v2637_v42 = vpack.c.bf16 %v372_v34, %v371_v33  ;;  %v2641_v56 = vpack.c.bf16 %v374_v48, %v373_v47  ;;  %v445_v33 = vld [vmem:[%s4589_s1 + $0x8a0] sm:$0xff] }
  0x73   : > { %2650 = vmatpush3.bf16.msra.mxu1 %v2649_v36  ;;  %1331 = vmatprep.mubr.f32.mxu1 %v693_v50  ;;  %v2667_v36 = vpack.c.bf16 %v420_v28, %v419_v26  ;;  %v2669_v44 = vpack.c.bf16 %v404_v57, %v403_v35  ;;  %v476_v21 = vld [vmem:[%s4589_s1 + $0x998] sm:$0xff]  ;;  %v427_v28 = vld [vmem:[%s4589_s1 + $0x810] sm:$0xff]  ;;  %v446_v34 = vld [vmem:[%s4589_s1 + $0x8a8] sm:$0xff] }
  0x74   : > { %2652 = vmatprep.subr.bf16.mxu1 %v2651_v41  ;;  %v422_v41 = vld [vmem:[%s4589_s1 + $0x7e8] sm:$0xff]  ;;  %v460_v45 = vld [vmem:[%s4589_s1 + $0x918] sm:$0xff] }
  0x75   : > { %2622 = vmatpush3.bf16.msra.mxu0 %v2621_v51  ;;  %v2671_v50 = vpack.c.bf16 %v422_v41, %v421_v40  ;;  %v406_v51 = vld [vmem:[%s4589_s1 + $0x768] sm:$0xff]  ;;  %v2687_v41 = vpack.c.bf16 %v446_v34, %v445_v33 }
  0x76   : > { %2624 = vmatprep.subr.bf16.mxu0 %v2623_v54  ;;  %v392_v54 = vld [vmem:[%s4589_s1 + $0x6f8] sm:$0xff]  ;;  %v478_v57 = vld [vmem:[%s4589_s1 + $0x9a8] sm:$0xff] }
  0x77   : > { %2654 = vmatpush3.bf16.msra.mxu1 %v2653_v52  ;;  %v391_v52 = vld [vmem:[%s4589_s1 + $0x6f0] sm:$0xff]  ;;  %v462_v48 = vld [vmem:[%s4589_s1 + $0x928] sm:$0xff] }
  0x78   : > { %2656 = vmatprep.subr.bf16.mxu1 %v2655_v59  ;;  %v2673_v59 = vpack.c.bf16 %v406_v51, %v405_v49  ;;  %v2643_v60 = vpack.c.bf16 %v392_v54, %v391_v52  ;;  %v447_v49 = vld [vmem:[%s4589_s1 + $0x8b0] sm:$0xff]  ;;  %v480_v52 = vld [vmem:[%s4589_s1 + $0x9b8] sm:$0xff] }
  0x79   : > { %2626 = vmatpush3.bf16.msra.mxu0 %v2625_v1  ;;  %v408_v1 = vld [vmem:[%s4589_s1 + $0x778] sm:$0xff]  ;;  %v479_v51 = vld [vmem:[%s4589_s1 + $0x9b0] sm:$0xff] }
  0x7a   : > { %2628 = vmatprep.subr.bf16.mxu0 %v2627_v3  ;;  %v442_v3 = vld [vmem:[%s4589_s1 + $0x888] sm:$0xff]  ;;  %v2723_v61 = vpack.c.bf16 %v480_v52, %v479_v51  ;;  %v471_v51 = vld [vmem:[%s4589_s1 + $0x970] sm:$0xff] }
  0x7b   : > { %2658 = vmatpush3.bf16.msra.mxu1 %v2657_v2  ;;  %v441_v2 = vld [vmem:[%s4589_s1 + $0x880] sm:$0xff] }
  0x7c   : > { %2660 = vmatprep.subr.bf16.mxu1 %v2659_v8  ;;  %v2677_v8 = vpack.c.bf16 %v408_v1, %v407_v63  ;;  %v2679_v9 = vpack.c.bf16 %v442_v3, %v441_v2  ;;  %v449_v63 = vld [vmem:[%s4589_s1 + $0x8c0] sm:$0xff]  ;;  %v482_v2 = vld [vmem:[%s4589_s1 + $0x9c8] sm:$0xff] }
  0x7d   : > { %2630 = vmatpush3.bf16.msra.mxu0 %v2629_v16  ;;  %v458_v16 = vld [vmem:[%s4589_s1 + $0x908] sm:$0xff]  ;;  %v481_v1 = vld [vmem:[%s4589_s1 + $0x9c0] sm:$0xff] }
  0x7e   : > { %2632 = vmatprep.subr.bf16.mxu0 %v2631_v18  ;;  %v444_v18 = vld [vmem:[%s4589_s1 + $0x898] sm:$0xff]  ;;  %v2713_v25 = vpack.c.bf16 %v458_v16, %v457_v13  ;;  %v2727_v10 = vpack.c.bf16 %v482_v2, %v481_v1  ;;  %v451_v13 = vld [vmem:[%s4589_s1 + $0x8d0] sm:$0xff]  ;;  %v521_v1 = vld [vmem:[%s4589_s1 + $0xb00] sm:$0xff] }
  0x7f   : > { %2662 = vmatpush3.bf16.msra.mxu1 %v2661_v17  ;;  %v443_v17 = vld [vmem:[%s4589_s1 + $0x890] sm:$0xff] }
  0x80   : > { %2664 = vmatprep.subr.bf16.mxu1 %v2663_v22  ;;  %v3941_v22 = vld [vmem:[%s3215_s7 + $0x10] sm:$0xff]  ;;  %v2683_v26 = vpack.c.bf16 %v444_v18, %v443_v17  ;;  %v484_v17 = vld [vmem:[%s4589_s1 + $0x9d8] sm:$0xff] }
  0x81   : > { %2634 = vmatpush3.bf16.msra.mxu0 %v2633_v29  ;;  %v428_v29 = vld [vmem:[%s4589_s1 + $0x818] sm:$0xff]  ;;  %v701_v35 = vrot.slane %v3941_v22, %v3218_v6  ;;  %v709_v37 = vrot.slane %v3941_v22, %v3230_v11  ;;  %v483_v16 = vld [vmem:[%s4589_s1 + $0x9d0] sm:$0xff] }
  0x82   : > { %2636 = vmatprep.subr.bf16.mxu0 %v2635_v32  ;;  %v2715_v32 = vpack.c.bf16 %v476_v21, %v475_v20  ;;  %v2685_v38 = vpack.c.bf16 %v428_v29, %v427_v28  ;;  %v435_v21 = vld [vmem:[%s4589_s1 + $0x850] sm:$0xff]  ;;  %v453_v28 = vld [vmem:[%s4589_s1 + $0x8e0] sm:$0xff]  ;;  %v454_v29 = vld [vmem:[%s4589_s1 + $0x8e8] sm:$0xff] }
  0x83   : > { %2666 = vmatpush3.bf16.msra.mxu1 %v2665_v30  ;;  %v459_v30 = vld [vmem:[%s4589_s1 + $0x910] sm:$0xff]  ;;  %v2703_v34 = vpack.c.bf16 %v454_v29, %v453_v28  ;;  %v725_v28 = vrot.slane %v3941_v22, %v3329_v58 }
  0x84   : > { %2668 = vmatprep.subr.bf16.mxu1 %v2667_v36  ;;  %v477_v36 = vld [vmem:[%s4589_s1 + $0x9a0] sm:$0xff]  ;;  %v2717_v40 = vpack.c.bf16 %v460_v45, %v459_v30 }
  0x85   : > { %2638 = vmatpush3.bf16.msra.mxu0 %v2637_v42  ;;  %v429_v42 = vld [vmem:[%s4589_s1 + $0x820] sm:$0xff]  ;;  %v2719_v47 = vpack.c.bf16 %v478_v57, %v477_v36  ;;  %v438_v36 = vld [vmem:[%s4589_s1 + $0x868] sm:$0xff] }
  0x86   : > { %2640 = vmatprep.subr.bf16.mxu0 %v2639_v46  ;;  %v461_v46 = vld [vmem:[%s4589_s1 + $0x920] sm:$0xff] }
  0x87   : > { %2670 = vmatpush3.bf16.msra.mxu1 %v2669_v44  ;;  %v430_v44 = vld [vmem:[%s4589_s1 + $0x828] sm:$0xff]  ;;  %v2721_v15 = vpack.c.bf16 %v462_v48, %v461_v46  ;;  %v485_v30 = vld [vmem:[%s4589_s1 + $0x9e0] sm:$0xff] }
  0x88   : > { %2672 = vmatprep.subr.bf16.mxu1 %v2671_v50  ;;  %v448_v50 = vld [vmem:[%s4589_s1 + $0x8b8] sm:$0xff]  ;;  %v2689_v54 = vpack.c.bf16 %v430_v44, %v429_v42  ;;  %v469_v57 = vld [vmem:[%s4589_s1 + $0x960] sm:$0xff]  ;;  %v487_v42 = vld [vmem:[%s4589_s1 + $0x9f0] sm:$0xff] }
  0x89   : > { %2642 = vmatpush3.bf16.msra.mxu0 %v2641_v56  ;;  %v2691_v55 = vpack.c.bf16 %v448_v50, %v447_v49  ;;  %v431_v56 = vld [vmem:[%s4589_s1 + $0x830] sm:$0xff]  ;;  %v488_v44 = vld [vmem:[%s4589_s1 + $0x9f8] sm:$0xff] }
  0x8a   : > { %2644 = vmatprep.subr.bf16.mxu0 %v2643_v60  ;;  %v463_v60 = vld [vmem:[%s4589_s1 + $0x930] sm:$0xff]  ;;  %v440_v50 = vld [vmem:[%s4589_s1 + $0x878] sm:$0xff]  ;;  %v2739_v52 = vpack.c.bf16 %v488_v44, %v487_v42 }
  0x8b   : > { %2674 = vmatpush3.bf16.msra.mxu1 %v2673_v59  ;;  %v432_v59 = vld [vmem:[%s4589_s1 + $0x838] sm:$0xff]  ;;  %v2725_v4 = vpack.c.bf16 %v464_v62, %v463_v60  ;;  %v439_v49 = vld [vmem:[%s4589_s1 + $0x870] sm:$0xff] }
  0x8c   : > { %2676 = vmatprep.subr.bf16.mxu1 %v2675_v0  ;;  %v450_v0 = vld [vmem:[%s4589_s1 + $0x8c8] sm:$0xff]  ;;  %v2693_v3 = vpack.c.bf16 %v432_v59, %v431_v56  ;;  %v537_v56 = vld [vmem:[%s4589_s1 + $0xb80] sm:$0xff]  ;;  %v2709_v60 = vpack.c.bf16 %v440_v50, %v439_v49  ;;  %v495_v42 = vld [vmem:[%s4589_s1 + $0xa30] sm:$0xff] }
  0x8d   : > { %2646 = vmatpush3.bf16.msra.mxu0 %v2645_v7  ;;  %v2695_v5 = vpack.c.bf16 %v450_v0, %v449_v63  ;;  %v433_v7 = vld [vmem:[%s4589_s1 + $0x840] sm:$0xff]  ;;  %v538_v59 = vld [vmem:[%s4589_s1 + $0xb88] sm:$0xff]  ;;  %v496_v44 = vld [vmem:[%s4589_s1 + $0xa38] sm:$0xff] }
  0x8e   : > { %2680 = vmatprep.subr.bf16.mxu0 %v2679_v9  ;;  %v465_v9 = vld [vmem:[%s4589_s1 + $0x940] sm:$0xff]  ;;  %v490_v0 = vld [vmem:[%s4589_s1 + $0xa08] sm:$0xff]  ;;  %v2775_v2 = vpack.c.bf16 %v538_v59, %v537_v56 }
  0x8f   : > { %2678 = vmatpush3.bf16.msra.mxu1 %v2677_v8  ;;  %v434_v8 = vld [vmem:[%s4589_s1 + $0x848] sm:$0xff]  ;;  %v489_v63 = vld [vmem:[%s4589_s1 + $0xa00] sm:$0xff] }
  0x90   : > { %2712 = vmatprep.subr.bf16.mxu1 %v2711_v14  ;;  %1262 = vmatmul.mubr.f32.vlgmr.msra.gmra.mrb[6].mxu0 %v681_v19  ;;  %v452_v14 = vld [vmem:[%s4589_s1 + $0x8d8] sm:$0xff]  ;;  %v2697_v18 = vpack.c.bf16 %v434_v8, %v433_v7  ;;  %v2729_v19 = vpack.c.bf16 %v466_v12, %v465_v9  ;;  %v697_v7 = vrot.slane %v3941_v22, %v3288_v39  ;;  %v539_v8 = vld [vmem:[%s4589_s1 + $0xb90] sm:$0xff]  ;;  %v513_v49 = vld [vmem:[%s4589_s1 + $0xac0] sm:$0xff] }
  0x91   : > { %2682 = vmatpush3.bf16.msra.mxu0 %v2681_v23  ;;  %1401 = vmatprep.mubr.f32.mxu0 %v701_v35  ;;  %v2699_v20 = vpack.c.bf16 %v452_v14, %v451_v13  ;;  %v436_v23 = vld [vmem:[%s4589_s1 + $0x858] sm:$0xff]  ;;  %v437_v35 = vld [vmem:[%s4589_s1 + $0x860] sm:$0xff]  ;;  %v705_v12 = vrot.slane %v3941_v22, %v3297_v43  ;;  %v514_v50 = vld [vmem:[%s4589_s1 + $0xac8] sm:$0xff] }
  0x92   : > { %1332 = vmatmul.mubr.f32.vlgmr.msra.gmra.mrb[6].mxu1 %v689_v24  ;;  %2684 = vmatprep.subr.bf16.mxu0 %v2683_v26  ;;  %v467_v24 = vld [vmem:[%s4589_s1 + $0x950] sm:$0xff]  ;;  %v468_v26 = vld [vmem:[%s4589_s1 + $0x958] sm:$0xff]  ;;  %v2701_v45 = vpack.c.bf16 %v436_v23, %v435_v21  ;;  %v2705_v46 = vpack.c.bf16 %v438_v36, %v437_v35  ;;  %v509_v21 = vld [vmem:[%s4589_s1 + $0xaa0] sm:$0xff] }
  0x93   : > { %2714 = vmatpush3.bf16.msra.mxu1 %v2713_v25  ;;  %1471 = vmatprep.mubr.f32.mxu1 %v709_v37  ;;  %v2731_v25 = vpack.c.bf16 %v484_v17, %v483_v16  ;;  %v2733_v33 = vpack.c.bf16 %v468_v26, %v467_v24  ;;  %v540_v9 = vld [vmem:[%s4589_s1 + $0xb98] sm:$0xff]  ;;  %v491_v16 = vld [vmem:[%s4589_s1 + $0xa10] sm:$0xff]  ;;  %v510_v23 = vld [vmem:[%s4589_s1 + $0xaa8] sm:$0xff]  ;;  %v717_v24 = vrot.slane %v3941_v22, %v3318_v53 }
  0x94   : > { %2716 = vmatprep.subr.bf16.mxu1 %v2715_v32  ;;  %v486_v32 = vld [vmem:[%s4589_s1 + $0x9e8] sm:$0xff]  ;;  %v492_v17 = vld [vmem:[%s4589_s1 + $0xa18] sm:$0xff]  ;;  %v493_v53 = vld [vmem:[%s4589_s1 + $0xa20] sm:$0xff] }
  0x95   : > { %2686 = vmatpush3.bf16.msra.mxu0 %v2685_v38  ;;  %v2735_v37 = vpack.c.bf16 %v486_v32, %v485_v30  ;;  %v470_v38 = vld [vmem:[%s4589_s1 + $0x968] sm:$0xff]  ;;  %v2749_v29 = vpack.c.bf16 %v492_v17, %v491_v16  ;;  %v2751_v32 = vpack.c.bf16 %v510_v23, %v509_v21  ;;  %v511_v35 = vld [vmem:[%s4589_s1 + $0xab0] sm:$0xff]  ;;  %v512_v36 = vld [vmem:[%s4589_s1 + $0xab8] sm:$0xff] }
  0x96   : > { %2688 = vmatprep.subr.bf16.mxu0 %v2687_v41  ;;  %v456_v41 = vld [vmem:[%s4589_s1 + $0x8f8] sm:$0xff]  ;;  %v542_v26 = vld [vmem:[%s4589_s1 + $0xba8] sm:$0xff]  ;;  %v497_v56 = vld [vmem:[%s4589_s1 + $0xa40] sm:$0xff] }
  0x97   : > { %2718 = vmatpush3.bf16.msra.mxu1 %v2717_v40  ;;  %v455_v40 = vld [vmem:[%s4589_s1 + $0x8f0] sm:$0xff]  ;;  %v498_v59 = vld [vmem:[%s4589_s1 + $0xa48] sm:$0xff]  ;;  %v549_v16 = vld [vmem:[%s4589_s1 + $0xbe0] sm:$0xff] }
  0x98   : > { %2720 = vmatprep.subr.bf16.mxu1 %v2719_v47  ;;  %v2737_v47 = vpack.c.bf16 %v470_v38, %v469_v57  ;;  %v2707_v48 = vpack.c.bf16 %v456_v41, %v455_v40  ;;  %v543_v57 = vld [vmem:[%s4589_s1 + $0xbb0] sm:$0xff]  ;;  %v2755_v41 = vpack.c.bf16 %v512_v36, %v511_v35  ;;  %v550_v17 = vld [vmem:[%s4589_s1 + $0xbe8] sm:$0xff]  ;;  %v501_v21 = vld [vmem:[%s4589_s1 + $0xa60] sm:$0xff] }
  0x99   : > { %2690 = vmatpush3.bf16.msra.mxu0 %v2689_v54  ;;  %v472_v54 = vld [vmem:[%s4589_s1 + $0x978] sm:$0xff]  ;;  %v502_v23 = vld [vmem:[%s4589_s1 + $0xa68] sm:$0xff]  ;;  %v535_v35 = vld [vmem:[%s4589_s1 + $0xb70] sm:$0xff] }
  0x9a   : > { %2692 = vmatprep.subr.bf16.mxu0 %v2691_v55  ;;  %v506_v55 = vld [vmem:[%s4589_s1 + $0xa88] sm:$0xff] }
  0x9b   : > { %2722 = vmatpush3.bf16.msra.mxu1 %v2721_v15  ;;  %v505_v15 = vld [vmem:[%s4589_s1 + $0xa80] sm:$0xff] }
  0x9c   : > { %2724 = vmatprep.subr.bf16.mxu1 %v2723_v61  ;;  %v2741_v61 = vpack.c.bf16 %v472_v54, %v471_v51  ;;  %v2743_v62 = vpack.c.bf16 %v506_v55, %v505_v15  ;;  %v545_v51 = vld [vmem:[%s4589_s1 + $0xbc0] sm:$0xff]  ;;  %v2757_v54 = vpack.c.bf16 %v496_v44, %v495_v42  ;;  %v2759_v55 = vpack.c.bf16 %v514_v50, %v513_v49 }
  0x9d   : > { %2694 = vmatpush3.bf16.msra.mxu0 %v2693_v3  ;;  %v522_v3 = vld [vmem:[%s4589_s1 + $0xb08] sm:$0xff]  ;;  %v585_v49 = vld [vmem:[%s4589_s1 + $0xd00] sm:$0xff] }
  0x9e   : > { %2696 = vmatprep.subr.bf16.mxu0 %v2695_v5  ;;  %v508_v5 = vld [vmem:[%s4589_s1 + $0xa98] sm:$0xff]  ;;  %v2777_v13 = vpack.c.bf16 %v522_v3, %v521_v1  ;;  %v547_v1 = vld [vmem:[%s4589_s1 + $0xbd0] sm:$0xff]  ;;  %v2761_v3 = vpack.c.bf16 %v498_v59, %v497_v56 }
  0x9f   : > { %2726 = vmatpush3.bf16.msra.mxu1 %v2725_v4  ;;  %v507_v4 = vld [vmem:[%s4589_s1 + $0xa90] sm:$0xff]  ;;  %v604_v56 = vld [vmem:[%s4589_s1 + $0xd98] sm:$0xff] }
  0xa0   : > { %2728 = vmatprep.subr.bf16.mxu1 %v2727_v10  ;;  %v2745_v10 = vpack.c.bf16 %v490_v0, %v489_v63  ;;  %v2747_v14 = vpack.c.bf16 %v508_v5, %v507_v4  ;;  %v515_v63 = vld [vmem:[%s4589_s1 + $0xad0] sm:$0xff]  ;;  %v516_v0 = vld [vmem:[%s4589_s1 + $0xad8] sm:$0xff] }
  0xa1   : > { %2698 = vmatpush3.bf16.msra.mxu0 %v2697_v18  ;;  %v523_v18 = vld [vmem:[%s4589_s1 + $0xb10] sm:$0xff]  ;;  %v2763_v5 = vpack.c.bf16 %v516_v0, %v515_v63  ;;  %v4344_v59 = vld [vmem:[%s3215_s7 + $0x18] sm:$0x1f]  ;;  %s2930_s7 = sshll.u32 %s2993_s16, 4  ;;  %s2931_s7 = int_to_ptr.vmem [resolvable:$false] %s2930_s7 }
  0xa2   : > { %2700 = vmatprep.subr.bf16.mxu0 %v2699_v20  ;;  %v524_v20 = vld [vmem:[%s4589_s1 + $0xb18] sm:$0xff]  ;;  %v555_v0 = vld [vmem:[%s4589_s1 + $0xc10] sm:$0xff]  ;;  %s2932_s5 = scalar_lea.vmem %s2931_s7, 32  ;;  %p2933_p0 = scmp.lt.s32.totalorder %s4548_s8, %s2931_s7 }
  0xa3   : > { %2730 = vmatpush3.bf16.msra.mxu1 %v2729_v19  ;;  %v2779_v19 = vpack.c.bf16 %v540_v9, %v539_v8  ;;  %v2781_v30 = vpack.c.bf16 %v524_v20, %v523_v18  ;;  %v500_v8 = vld [vmem:[%s4589_s1 + $0xa58] sm:$0xff]  ;;  %v531_v9 = vld [vmem:[%s4589_s1 + $0xb50] sm:$0xff]  ;;  %p2934_p1 = scmp.lt.s32.totalorder %s2932_s5, %s2926_s19 }
  0xa4   : > { %2732 = vmatprep.subr.bf16.mxu1 %v2731_v25  ;;  %v541_v25 = vld [vmem:[%s4589_s1 + $0xba0] sm:$0xff] }
  0xa5   : > { %2702 = vmatpush3.bf16.msra.mxu0 %v2701_v45  ;;  %v494_v45 = vld [vmem:[%s4589_s1 + $0xa28] sm:$0xff]  ;;  %v2783_v58 = vpack.c.bf16 %v542_v26, %v541_v25  ;;  %v2799_v25 = vpack.c.bf16 %v550_v17, %v549_v16  ;;  %v589_v16 = vld [vmem:[%s4589_s1 + $0xd20] sm:$0xff]  ;;  %p2935_p2 = por %p2934_p1, %p2933_p0 }
  0xa6   : > { %2704 = vmatprep.subr.bf16.mxu0 %v2703_v34  ;;  %v526_v34 = vld [vmem:[%s4589_s1 + $0xb28] sm:$0xff]  ;;  %v2753_v38 = vpack.c.bf16 %v494_v45, %v493_v53  ;;  %v2769_v53 = vpack.c.bf16 %v502_v23, %v501_v21  ;;  %v608_v21 = vld [vmem:[%s4589_s1 + $0xdb8] sm:$0xff] }
  0xa7   : > { %2734 = vmatpush3.bf16.msra.mxu1 %v2733_v33  ;;  %v525_v33 = vld [vmem:[%s4589_s1 + $0xb20] sm:$0xff]  ;;  %v534_v26 = vld [vmem:[%s4589_s1 + $0xb68] sm:$0xff]  ;;  %p2936_p3 = pnand %p2935_p2, %p2929_p13 }
  0xa8   : > { %2736 = vmatprep.subr.bf16.mxu1 %v2735_v37  ;;  %v544_v37 = vld [vmem:[%s4589_s1 + $0xbb8] sm:$0xff]  ;;  %v2785_v40 = vpack.c.bf16 %v526_v34, %v525_v33  ;;  %v590_v17 = vld [vmem:[%s4589_s1 + $0xd28] sm:$0xff] }
  0xa9   : > { %2706 = vmatpush3.bf16.msra.mxu0 %v2705_v46  ;;  %v527_v46 = vld [vmem:[%s4589_s1 + $0xb30] sm:$0xff]  ;;  %v504_v34 = vld [vmem:[%s4589_s1 + $0xa78] sm:$0xff] }
  0xaa   : > { %2708 = vmatprep.subr.bf16.mxu0 %v2707_v48  ;;  %v528_v48 = vld [vmem:[%s4589_s1 + $0xb38] sm:$0xff] }
  0xab   : > { %2738 = vmatpush3.bf16.msra.mxu1 %v2737_v47  ;;  %v2787_v47 = vpack.c.bf16 %v544_v37, %v543_v57  ;;  %v2789_v15 = vpack.c.bf16 %v528_v48, %v527_v46  ;;  %v536_v57 = vld [vmem:[%s4589_s1 + $0xb78] sm:$0xff]  ;;  %v569_v37 = vld [vmem:[%s4589_s1 + $0xc80] sm:$0xff]  ;;  %v554_v48 = vld [vmem:[%s4589_s1 + $0xc08] sm:$0xff] }
  0xac   : > { %2740 = vmatprep.subr.bf16.mxu1 %v2739_v52  ;;  %v546_v52 = vld [vmem:[%s4589_s1 + $0xbc8] sm:$0xff]  ;;  %v2805_v44 = vpack.c.bf16 %v536_v57, %v535_v35  ;;  %v561_v57 = vld [vmem:[%s4589_s1 + $0xc40] sm:$0xff] }
  0xad   : > { %2710 = vmatpush3.bf16.msra.mxu0 %v2709_v60  ;;  %v529_v60 = vld [vmem:[%s4589_s1 + $0xb40] sm:$0xff] }
  0xae   : > { %2744 = vmatprep.subr.bf16.mxu0 %v2743_v62  ;;  %v530_v62 = vld [vmem:[%s4589_s1 + $0xb48] sm:$0xff] }
  0xaf   : > { %2742 = vmatpush3.bf16.msra.mxu1 %v2741_v61  ;;  %v2791_v61 = vpack.c.bf16 %v546_v52, %v545_v51  ;;  %v2793_v4 = vpack.c.bf16 %v530_v62, %v529_v60  ;;  %v586_v51 = vld [vmem:[%s4589_s1 + $0xd08] sm:$0xff]  ;;  %v571_v52 = vld [vmem:[%s4589_s1 + $0xc90] sm:$0xff] }
  0xb0   : > { %2776 = vmatprep.subr.bf16.mxu1 %v2775_v2  ;;  %1402 = vmatmul.mubr.f32.vlgmr.msra.gmra.mrb[8].mxu0 %v697_v7  ;;  %v548_v2 = vld [vmem:[%s4589_s1 + $0xbd8] sm:$0xff]  ;;  %v499_v7 = vld [vmem:[%s4589_s1 + $0xa50] sm:$0xff]  ;;  %v2841_v62 = vpack.c.bf16 %v586_v51, %v585_v49 }
  0xb1   : > { %2746 = vmatpush3.bf16.msra.mxu0 %v2745_v10  ;;  %1541 = vmatprep.mubr.f32.mxu0 %v717_v24  ;;  %v2795_v10 = vpack.c.bf16 %v548_v2, %v547_v1  ;;  %v2765_v18 = vpack.c.bf16 %v500_v8, %v499_v7  ;;  %v533_v24 = vld [vmem:[%s4589_s1 + $0xb60] sm:$0xff]  ;;  %v556_v1 = vld [vmem:[%s4589_s1 + $0xc18] sm:$0xff]  ;;  %v587_v2 = vld [vmem:[%s4589_s1 + $0xd10] sm:$0xff] }
  0xb2   : > { %1472 = vmatmul.mubr.f32.vlgmr.msra.gmra.mrb[8].mxu1 %v705_v12  ;;  %2748 = vmatprep.subr.bf16.mxu0 %v2747_v14  ;;  %v532_v12 = vld [vmem:[%s4589_s1 + $0xb58] sm:$0xff]  ;;  %v518_v14 = vld [vmem:[%s4589_s1 + $0xae8] sm:$0xff]  ;;  %v2801_v45 = vpack.c.bf16 %v534_v26, %v533_v24  ;;  %v605_v7 = vld [vmem:[%s4589_s1 + $0xda0] sm:$0xff]  ;;  %v2849_v24 = vpack.c.bf16 %v590_v17, %v589_v16 }
  0xb3   : > { %2778 = vmatpush3.bf16.msra.mxu1 %v2777_v13  ;;  %1611 = vmatprep.mubr.f32.mxu1 %v725_v28  ;;  %v517_v13 = vld [vmem:[%s4589_s1 + $0xae0] sm:$0xff]  ;;  %v519_v28 = vld [vmem:[%s4589_s1 + $0xaf0] sm:$0xff]  ;;  %v606_v8 = vld [vmem:[%s4589_s1 + $0xda8] sm:$0xff] }
  0xb4   : > { %2780 = vmatprep.subr.bf16.mxu1 %v2779_v19  ;;  %v2797_v19 = vpack.c.bf16 %v532_v12, %v531_v9  ;;  %v2767_v20 = vpack.c.bf16 %v518_v14, %v517_v13  ;;  %v741_v9 = vrot.slane %v4344_v59, %v3230_v11  ;;  %v558_v14 = vld [vmem:[%s4589_s1 + $0xc28] sm:$0xff]  ;;  %v2847_v11 = vpack.c.bf16 %v606_v8, %v605_v7  ;;  %v559_v26 = vld [vmem:[%s4589_s1 + $0xc30] sm:$0xff]  ;;  %v584_v7 = vld [vmem:[%s4589_s1 + $0xcf8] sm:$0xff] }
  0xb5   : > { %2750 = vmatpush3.bf16.msra.mxu0 %v2749_v29  ;;  %v520_v29 = vld [vmem:[%s4589_s1 + $0xaf8] sm:$0xff]  ;;  %v563_v51 = vld [vmem:[%s4589_s1 + $0xc50] sm:$0xff] }
  0xb6   : > { %2752 = vmatprep.subr.bf16.mxu0 %v2751_v32  ;;  %v552_v32 = vld [vmem:[%s4589_s1 + $0xbf8] sm:$0xff]  ;;  %v2771_v33 = vpack.c.bf16 %v520_v29, %v519_v28  ;;  %v591_v29 = vld [vmem:[%s4589_s1 + $0xd30] sm:$0xff] }
  0xb7   : > { %2782 = vmatpush3.bf16.msra.mxu1 %v2781_v30  ;;  %v551_v30 = vld [vmem:[%s4589_s1 + $0xbf0] sm:$0xff]  ;;  %v560_v28 = vld [vmem:[%s4589_s1 + $0xc38] sm:$0xff] }
  0xb8   : > { %2784 = vmatprep.subr.bf16.mxu1 %v2783_v58  ;;  %v503_v58 = vld [vmem:[%s4589_s1 + $0xa70] sm:$0xff]  ;;  %v2803_v36 = vpack.c.bf16 %v552_v32, %v551_v30  ;;  %v592_v32 = vld [vmem:[%s4589_s1 + $0xd38] sm:$0xff] }
  0xb9   : > { %2754 = vmatpush3.bf16.msra.mxu0 %v2753_v38  ;;  %v570_v38 = vld [vmem:[%s4589_s1 + $0xc88] sm:$0xff]  ;;  %v2773_v42 = vpack.c.bf16 %v504_v34, %v503_v58  ;;  %v2821_v34 = vpack.c.bf16 %v560_v28, %v559_v26  ;;  %v2853_v35 = vpack.c.bf16 %v592_v32, %v591_v29  ;;  %v615_v8 = vld [vmem:[%s4589_s1 + $0xdf0] sm:$0xff]  ;;  %v600_v17 = vld [vmem:[%s4589_s1 + $0xd78] sm:$0xff]  ;;  %v2990_v26 = vmov 0.0|0.0  }
  0xba   : > { %2756 = vmatprep.subr.bf16.mxu0 %v2755_v41  ;;  %v602_v41 = vld [vmem:[%s4589_s1 + $0xd88] sm:$0xff]  ;;  %v2807_v46 = vpack.c.bf16 %v570_v38, %v569_v37  ;;  %v593_v38 = vld [vmem:[%s4589_s1 + $0xd40] sm:$0xff]  ;;  %v619_v28 = vld [vmem:[%s4589_s1 + $0xe10] sm:$0xff]  ;;  %v2992_v32 = vmov 0.0  }
  0xbb   : > { %2786 = vmatpush3.bf16.msra.mxu1 %v2785_v40  ;;  %v601_v40 = vld [vmem:[%s4589_s1 + $0xd80] sm:$0xff]  ;;  %v610_v58 = vld [vmem:[%s4589_s1 + $0xdc8] sm:$0xff]  ;;  %v620_v29 = vld [vmem:[%s4589_s1 + $0xe18] sm:$0xff] }
  0xbc   : > { %2788 = vmatprep.subr.bf16.mxu1 %v2787_v47  ;;  %v553_v47 = vld [vmem:[%s4589_s1 + $0xc00] sm:$0xff]  ;;  %v2839_v50 = vpack.c.bf16 %v602_v41, %v601_v40  ;;  %v562_v37 = vld [vmem:[%s4589_s1 + $0xc48] sm:$0xff] }
  0xbd   : > { %2758 = vmatpush3.bf16.msra.mxu0 %v2757_v54  ;;  %v572_v54 = vld [vmem:[%s4589_s1 + $0xc98] sm:$0xff]  ;;  %v2809_v60 = vpack.c.bf16 %v554_v48, %v553_v47  ;;  %v594_v41 = vld [vmem:[%s4589_s1 + $0xd48] sm:$0xff]  ;;  %v2825_v48 = vpack.c.bf16 %v562_v37, %v561_v57 }
  0xbe   : > { %2760 = vmatprep.subr.bf16.mxu0 %v2759_v55  ;;  %v603_v55 = vld [vmem:[%s4589_s1 + $0xd90] sm:$0xff]  ;;  %v2811_v63 = vpack.c.bf16 %v572_v54, %v571_v52  ;;  %v612_v47 = vld [vmem:[%s4589_s1 + $0xdd8] sm:$0xff]  ;;  %v2857_v49 = vpack.c.bf16 %v594_v41, %v593_v38 }
  0xbf   : > { %2790 = vmatpush3.bf16.msra.mxu1 %v2789_v15  ;;  %v713_v15 = vrot.slane %v3941_v22, %v3500_v27  ;;  %v564_v52 = vld [vmem:[%s4589_s1 + $0xc58] sm:$0xff]  ;;  %v595_v54 = vld [vmem:[%s4589_s1 + $0xd50] sm:$0xff] }
  0xc0   : > { %2792 = vmatprep.subr.bf16.mxu1 %v2791_v61  ;;  %v721_v61 = vrot.slane %v3941_v22, %v3509_v31  ;;  %v588_v31 = vld [vmem:[%s4589_s1 + $0xd18] sm:$0xff]  ;;  %v573_v22 = vld [vmem:[%s4589_s1 + $0xca0] sm:$0xff] }
  0xc1   : > { %2762 = vmatpush3.bf16.msra.mxu0 %v2761_v3  ;;  %v2843_v3 = vpack.c.bf16 %v604_v56, %v603_v55  ;;  %v2845_v12 = vpack.c.bf16 %v588_v31, %v587_v2  ;;  %v596_v55 = vld [vmem:[%s4589_s1 + $0xd58] sm:$0xff]  ;;  %v581_v56 = vld [vmem:[%s4589_s1 + $0xce0] sm:$0xff] }
  0xc2   : > { %2764 = vmatprep.subr.bf16.mxu0 %v2763_v5  ;;  %v733_v5 = vrot.slane %v4344_v59, %v3218_v6  ;;  %v557_v6 = vld [vmem:[%s4589_s1 + $0xc20] sm:$0xff] }
  0xc3   : > { %2794 = vmatpush3.bf16.msra.mxu1 %v2793_v4  ;;  %v574_v4 = vld [vmem:[%s4589_s1 + $0xca8] sm:$0xff]  ;;  %v2817_v23 = vpack.c.bf16 %v558_v14, %v557_v6  ;;  %v565_v2 = vld [vmem:[%s4589_s1 + $0xc60] sm:$0xff]  ;;  %v567_v6 = vld [vmem:[%s4589_s1 + $0xc70] sm:$0xff] }
  0xc4   : > { %2796 = vmatprep.subr.bf16.mxu1 %v2795_v10  ;;  %v2813_v10 = vpack.c.bf16 %v556_v1, %v555_v0  ;;  %v2815_v13 = vpack.c.bf16 %v574_v4, %v573_v22  ;;  %v2861_v0 = vpack.c.bf16 %v596_v55, %v595_v54  ;;  %v597_v31 = vld [vmem:[%s4589_s1 + $0xd60] sm:$0xff]  ;;  %v598_v4 = vld [vmem:[%s4589_s1 + $0xd68] sm:$0xff]  ;;  %v568_v14 = vld [vmem:[%s4589_s1 + $0xc78] sm:$0xff] }
  0xc5   : > { %2766 = vmatpush3.bf16.msra.mxu0 %v2765_v18  ;;  %v575_v18 = vld [vmem:[%s4589_s1 + $0xcb0] sm:$0xff] }
  0xc6   : > { %2768 = vmatprep.subr.bf16.mxu0 %v2767_v20  ;;  %v607_v20 = vld [vmem:[%s4589_s1 + $0xdb0] sm:$0xff] }
  0xc7   : > { %2798 = vmatpush3.bf16.msra.mxu1 %v2797_v19  ;;  %v576_v19 = vld [vmem:[%s4589_s1 + $0xcb8] sm:$0xff]  ;;  %v2851_v30 = vpack.c.bf16 %v608_v21, %v607_v20  ;;  %v617_v20 = vld [vmem:[%s4589_s1 + $0xe00] sm:$0xff]  ;;  %v618_v21 = vld [vmem:[%s4589_s1 + $0xe08] sm:$0xff] }
  0xc8   : > { %2800 = vmatprep.subr.bf16.mxu1 %v2799_v25  ;;  %v2819_v25 = vpack.c.bf16 %v576_v19, %v575_v18  ;;  %v2837_v18 = vpack.c.bf16 %v568_v14, %v567_v6 }
  0xc9   : > { %2770 = vmatpush3.bf16.msra.mxu0 %v2769_v53  ;;  %v577_v53 = vld [vmem:[%s4589_s1 + $0xcc0] sm:$0xff] }
  0xca   : > { %2772 = vmatprep.subr.bf16.mxu0 %v2771_v33  ;;  %v609_v33 = vld [vmem:[%s4589_s1 + $0xdc0] sm:$0xff] }
  0xcb   : > { %2802 = vmatpush3.bf16.msra.mxu1 %v2801_v45  ;;  %v578_v45 = vld [vmem:[%s4589_s1 + $0xcc8] sm:$0xff]  ;;  %v2855_v40 = vpack.c.bf16 %v610_v58, %v609_v33  ;;  %v624_v33 = vld [vmem:[%s4589_s1 + $0xe38] sm:$0xff] }
  0xcc   : > { %2804 = vmatprep.subr.bf16.mxu1 %v2803_v36  ;;  %v2823_v36 = vpack.c.bf16 %v578_v45, %v577_v53  ;;  %v623_v45 = vld [vmem:[%s4589_s1 + $0xe30] sm:$0xff] }
  0xcd   : > { %2774 = vmatpush3.bf16.msra.mxu0 %v2773_v42  ;;  %v579_v42 = vld [vmem:[%s4589_s1 + $0xcd0] sm:$0xff]  ;;  %v2881_v58 = vpack.c.bf16 %v624_v33, %v623_v45 }
  0xce   : > { %2808 = vmatprep.subr.bf16.mxu0 %v2807_v46  ;;  %v611_v46 = vld [vmem:[%s4589_s1 + $0xdd0] sm:$0xff] }
  0xcf   : > { %2806 = vmatpush3.bf16.msra.mxu1 %v2805_v44  ;;  %v580_v44 = vld [vmem:[%s4589_s1 + $0xcd8] sm:$0xff] }
  0xd0   : > { %2840 = vmatprep.subr.bf16.mxu1 %v2839_v50  ;;  %1542 = vmatmul.mubr.f32.vlgmr.msra.gmra.mrb[10].mxu0 %v713_v15  ;;  %v2827_v50 = vpack.c.bf16 %v580_v44, %v579_v42  ;;  %v2859_v15 = vpack.c.bf16 %v612_v47, %v611_v46 }
  0xd1   : > { %2810 = vmatpush3.bf16.msra.mxu0 %v2809_v60  ;;  %1681 = vmatprep.mubr.f32.mxu0 %v733_v5  ;;  %v582_v60 = vld [vmem:[%s4589_s1 + $0xce8] sm:$0xff]  ;;  %v583_v5 = vld [vmem:[%s4589_s1 + $0xcf0] sm:$0xff] }
  0xd2   : > { %1612 = vmatmul.mubr.f32.vlgmr.msra.gmra.mrb[10].mxu1 %v721_v61  ;;  %2812 = vmatprep.subr.bf16.mxu0 %v2811_v63  ;;  %v613_v61 = vld [vmem:[%s4589_s1 + $0xde0] sm:$0xff]  ;;  %v2829_v63 = vpack.c.bf16 %v564_v52, %v563_v51  ;;  %v2831_v1 = vpack.c.bf16 %v582_v60, %v581_v56 }
  0xd3   : > { %2842 = vmatpush3.bf16.msra.mxu1 %v2841_v62  ;;  %1751 = vmatprep.mubr.f32.mxu1 %v741_v9  ;;  %v614_v62 = vld [vmem:[%s4589_s1 + $0xde8] sm:$0xff]  ;;  %v616_v9 = vld [vmem:[%s4589_s1 + $0xdf8] sm:$0xff] }
  0xd4   : > { %2844 = vmatprep.subr.bf16.mxu1 %v2843_v3  ;;  %v566_v3 = vld [vmem:[%s4589_s1 + $0xc68] sm:$0xff]  ;;  %v2863_v22 = vpack.c.bf16 %v614_v62, %v613_v61  ;;  %v2867_v16 = vpack.c.bf16 %v616_v9, %v615_v8 }
  0xd5   : > { %2814 = vmatpush3.bf16.msra.mxu0 %v2813_v10  ;;  %v2833_v10 = vpack.c.bf16 %v566_v3, %v565_v2 }
  0xd6   : > { %2816 = vmatprep.subr.bf16.mxu0 %v2815_v13  ;;  %v2835_v13 = vpack.c.bf16 %v584_v7, %v583_v5 }
  0xd7   : > { %2846 = vmatpush3.bf16.msra.mxu1 %v2845_v12  ;;  %v2865_v12 = vpack.c.bf16 %v598_v4, %v597_v31 }
  0xd8   : > { %2848 = vmatprep.subr.bf16.mxu1 %v2847_v11  ;;  %v599_v11 = vld [vmem:[%s4589_s1 + $0xd70] sm:$0xff] }
  0xd9   : > { %2818 = vmatpush3.bf16.msra.mxu0 %v2817_v23  ;;  %v2869_v19 = vpack.c.bf16 %v600_v17, %v599_v11  ;;  %v729_v23 = vrot.slane %v4344_v59, %v3288_v39  ;;  %v2875_v39 = vpack.c.bf16 %v620_v29, %v619_v28 }
  0xda   : > { %2820 = vmatprep.subr.bf16.mxu0 %v2819_v25  ;;  %v737_v25 = vrot.slane %v4344_v59, %v3297_v43  ;;  %v621_v43 = vld [vmem:[%s4589_s1 + $0xe20] sm:$0xff] }
  0xdb   : > { %2850 = vmatpush3.bf16.msra.mxu1 %v2849_v24  ;;  %v2872_v24 = vpack.c.bf16 %v618_v21, %v617_v20 }
  0xdc   : > { %2852 = vmatprep.subr.bf16.mxu1 %v2851_v30  ;;  %v622_v30 = vld [vmem:[%s4589_s1 + $0xe28] sm:$0xff] }
  0xdd   : > { %2822 = vmatpush3.bf16.msra.mxu0 %v2821_v34  ;;  %v2878_v53 = vpack.c.bf16 %v622_v30, %v621_v43  ;;  %v745_v34 = vrot.slane %v4344_v59, %v3500_v27 }
  0xde   : > { %2824 = vmatprep.subr.bf16.mxu0 %v2823_v36  ;;  %v625_v36 = vld [vmem:[%s4590_s2] sm:$0x1] }
  0xdf   : > { %2854 = vmatpush3.bf16.msra.mxu1 %v2853_v35 }
  0xe0   : > { %2856 = vmatprep.subr.bf16.mxu1 %v2855_v40 }
  0xe1   : > { %2826 = vmatpush3.bf16.msra.mxu0 %v2825_v48 }
  0xe2   : > { %2828 = vmatprep.subr.bf16.mxu0 %v2827_v50 }
  0xe3   : > { %2858 = vmatpush3.bf16.msra.mxu1 %v2857_v49 }
  0xe4   : > { %2860 = vmatprep.subr.bf16.mxu1 %v2859_v15 }
  0xe5   : > { %2830 = vmatpush3.bf16.msra.mxu0 %v2829_v63 }
  0xe6   : > { %2832 = vmatprep.subr.bf16.mxu0 %v2831_v1 }
  0xe7   : > { %2862 = vmatpush3.bf16.msra.mxu1 %v2861_v0 }
  0xe8   : > { %2864 = vmatprep.subr.bf16.mxu1 %v2863_v22 }
  0xe9   : > { %2834 = vmatpush3.bf16.msra.mxu0 %v2833_v10 }
  0xea   : > { %2836 = vmatprep.subr.bf16.mxu0 %v2835_v13 }
  0xeb   : > { %2866 = vmatpush3.bf16.msra.mxu1 %v2865_v12 }
  0xec   : > { %2868 = vmatprep.subr.bf16.mxu1 %v2867_v16 }
  0xed   : > { %2838 = vmatpush3.bf16.msra.mxu0 %v2837_v18 }
  0xee   : > { %2871 = vmatprep.subr.bf16.mxu0 %v2990_v26 }
  0xef   : > { %2870 = vmatpush3.bf16.msra.mxu1 %v2869_v19 }
  0xf0   : > { %1682 = vmatmul.mubr.f32.vlgmr.msra.gmra.mrb[12].mxu0 %v729_v23 }
  0xf1   : > { %2873 = vmatpush3.bf16.msra.mxu0 %v2872_v24  ;;  %2420 = vmatprep.mubr.msk.f32.mxu0 %vm2991_vm0, %v2992_v32 }
  0xf2   : > { %1752 = vmatmul.mubr.f32.vlgmr.msra.gmra.mrb[12].mxu1 %v737_v25  ;;  %2874 = vmatprep.subr.bf16.mxu0 %v2990_v26 }
  0xf5   : > { %2876 = vmatpush3.bf16.msra.mxu0 %v2875_v39 }
  0xf6   : > { %2877 = vmatprep.subr.bf16.mxu0 %v2990_v26 }
  0xf9   : > { %2879 = vmatpush3.bf16.msra.mxu0 %v2878_v53 }
  0xfa   : > { %2880 = vmatprep.subr.bf16.mxu0 %v2990_v26 }
  0xfd   : > { %2882 = vmatpush3.bf16.msra.mxu0 %v2881_v58 }
 0x100   : > { %2421 = vmatmul.mubr.msk.f32.vlgmr.msra.gmra.mrb[14].mxu0 %vm774_vm1, %v745_v34 }
 0x103   : > { %v1937_v35 = vpop.f32.mrb[0].mxu0 }
 0x104   : > { %v1938_v57 = vpop.f32.mrb[1].mxu0 }
 0x105   : > { %v1972_v37 = vpop.f32.mrb[0].mxu1  ;;  %v1939_v38 = vadd.f32 %v1938_v57, %v1937_v35 }
 0x106   : > { %v1973_v40 = vpop.f32.mrb[1].mxu1 }
 0x107   : > { %v1974_v41 = vadd.f32 %v1973_v40, %v1972_v37  ;;  %v844_v42 = vadd.f32 %v1939_v38, %v625_v36 }
 0x109   : > { %v914_v44 = vadd.f32 %v1974_v41, %v844_v42 }
 0x123   : > { %v2007_v46 = vpop.f32.mrb[2].mxu0 }
 0x124   : > { %v2008_v47 = vpop.f32.mrb[3].mxu0 }
 0x125   : > { %v2042_v48 = vpop.f32.mrb[2].mxu1  ;;  %v2009_v49 = vadd.f32 %v2008_v47, %v2007_v46 }
 0x126   : > { %v2043_v27 = vpop.f32.mrb[3].mxu1 }
 0x127   : > { %v2044_v59 = vadd.f32 %v2043_v27, %v2042_v48  ;;  %v984_v50 = vadd.f32 %v2009_v49, %v914_v44 }
 0x129   : > { %v1054_v51 = vadd.f32 %v2044_v59, %v984_v50 }
 0x143   : > { %v2077_v52 = vpop.f32.mrb[4].mxu0 }
 0x144   : > { %v2078_v54 = vpop.f32.mrb[5].mxu0 }
 0x145   : > { %v2112_v15 = vpop.f32.mrb[4].mxu1  ;;  %v2079_v55 = vadd.f32 %v2078_v54, %v2077_v52 }
 0x146   : > { %v2113_v56 = vpop.f32.mrb[5].mxu1 }
 0x147   : > { %v2114_v60 = vadd.f32 %v2113_v56, %v2112_v15  ;;  %v1124_v61 = vadd.f32 %v2079_v55, %v1054_v51 }
 0x149   : > { %v1194_v62 = vadd.f32 %v2114_v60, %v1124_v61 }
 0x163   : > { %v2147_v63 = vpop.f32.mrb[6].mxu0 }
 0x164   : > { %v2148_v0 = vpop.f32.mrb[7].mxu0 }
 0x165   : > { %v2182_v1 = vpop.f32.mrb[6].mxu1  ;;  %v2149_v2 = vadd.f32 %v2148_v0, %v2147_v63 }
 0x166   : > { %v2183_v3 = vpop.f32.mrb[7].mxu1 }
 0x167   : > { %v2184_v31 = vadd.f32 %v2183_v3, %v2182_v1  ;;  %v1264_v22 = vadd.f32 %v2149_v2, %v1194_v62 }
 0x169   : > { %v1334_v4 = vadd.f32 %v2184_v31, %v1264_v22 }
 0x183   : > { %v2217_v5 = vpop.f32.mrb[8].mxu0 }
 0x184   : > { %v2218_v7 = vpop.f32.mrb[9].mxu0 }
 0x185   : > { %v2252_v8 = vpop.f32.mrb[8].mxu1  ;;  %v2219_v9 = vadd.f32 %v2218_v7, %v2217_v5 }
 0x186   : > { %v2253_v10 = vpop.f32.mrb[9].mxu1 }
 0x187   : > { %v2254_v12 = vadd.f32 %v2253_v10, %v2252_v8  ;;  %v1404_v13 = vadd.f32 %v2219_v9, %v1334_v4 }
 0x189   : > { %v1474_v6 = vadd.f32 %v2254_v12, %v1404_v13 }
 0x1a3   : > { %v2287_v14 = vpop.f32.mrb[10].mxu0 }
 0x1a4   : > { %v2288_v16 = vpop.f32.mrb[11].mxu0 }
 0x1a5   : > { %v2322_v11 = vpop.f32.mrb[10].mxu1  ;;  %v2289_v17 = vadd.f32 %v2288_v16, %v2287_v14 }
 0x1a6   : > { %v2323_v18 = vpop.f32.mrb[11].mxu1 }
 0x1a7   : > { %v2324_v19 = vadd.f32 %v2323_v18, %v2322_v11  ;;  %v1544_v20 = vadd.f32 %v2289_v17, %v1474_v6 }
 0x1a9   : > { %v1614_v21 = vadd.f32 %v2324_v19, %v1544_v20 }
 0x1c3   : > { %v2357_v23 = vpop.f32.mrb[12].mxu0 }
 0x1c4   : > { %v2358_v24 = vpop.f32.mrb[13].mxu0 }
 0x1c5   : > { %v2392_v25 = vpop.f32.mrb[12].mxu1  ;;  %v2359_v26 = vadd.f32 %v2358_v24, %v2357_v23 }
 0x1c6   : > { %v2393_v28 = vpop.f32.mrb[13].mxu1 }
 0x1c7   : > { %v2394_v29 = vadd.f32 %v2393_v28, %v2392_v25  ;;  %v1684_v39 = vadd.f32 %v2359_v26, %v1614_v21 }
 0x1c9   : > { %v1754_v43 = vadd.f32 %v2394_v29, %v1684_v39 }
 0x1d3   : > { %v1823_v30 = vpop.f32.mrb[14].mxu0 }
 0x1d4   : > { %v1824_v32 = vadd.f32 %v1823_v30, %v1754_v43  ;;  %v2422_v53 = vpop.f32.mrb[15].mxu0 }
 0x1d6   : > { %1828 = vst.msk [vmem:[%s160_s6] sm:$0x1] %vm1827_vm2, %v1824_v32 }
 0x1d7   : > { %2939 = shalt.err (!%p2936_p3)
}
 0x1d8   : > { %s2940_s30 = scalar_lea.hbm %s4546_s11, 16  ;;  %s2944_s25 = scalar_lea.hbm %s4591_s3, 32 }
 0x1d9   : > { %p2941_p4 = scmp.ne.s32.totalorder %s4546_s11, %s2940_s30  ;;  %p2945_p9 = scmp.lt.u32.totalorder %s4546_s11, %s4591_s3 }
 0x1da   : > { %p2946_p10 = scmp.lt.u32.totalorder %s2944_s25, %s2940_s30  ;;  %p2948_p12 = scmp.lt.u32.totalorder %s2940_s30, %s4546_s11 }
 0x1db   : > { %p2942_p7 = pnand %p2941_p4, %p3052_p5 }
 0x1dc   : > { %p2947_p11 = por %p2946_p10, %p2945_p9 }
 0x1dd   : > { %p2943_p8 = pneg %p2942_p7 }
 0x1de   : > { %p2949_p13 = por %p2948_p12, %p2947_p11 }
 0x1e0   : > { %p2950_p0 = pnand %p2949_p13, %p2943_p8 }
 0x1e2   : > { %2953 = shalt.err (!%p2950_p0)
}
 0x1e3   : > { %2884 = dma.vmem_to_hbm [thread:$0]  (%p3052_p5), %s4548_s8, 16, %s4546_s11, %s1830_s17  }
 0x1e4 PF: > { %p2890_p1 = scmp.ge.s32.totalorder %s2988_s15, 2  ;;  %s1854_s28 = sand.u32 1, %s2976_s12  }
 0x1e5   : > { %s1855_s29 = scalar_lea.sflag [#allocation3], %s1854_s28 }
 0x1e6   : > { %p2887_p2 = pnand %p2890_p1, %p3056_p6 }
 0x1e8   : > { %2971 = dma.done.wait (!%p2887_p2), %s1855_s29, 16  }
 0x1e9   : > { %2973 = vsyncadd (!%p2887_p2), %s1855_s29, 4294967280  ;;  %p13_p3 = scmp.ge.s32.totalorder %s3039_s18, 4   ;;  %s4594_s12 = smov %s2980_s13 }
 0x1ea   : > { %s4595_s13 = smov %s2984_s14  ;;  %s4596_s14 = smov %s3050_s21 }
 0x1eb   : > { %s4597_s15 = smov %s3039_s18  ;;  %15 = sbr.rel (!%p13_p3) target bundleno = 3 (0x3), region = 67 }
 0x1f2   :  { %1859 = vsyncpa [#allocation3], 1 }
 0x1f3   :  { %1861 = vsyncpa [#allocation3 + $0x1], 1 }

</bundles_post_ra>
